<compile_context>
chip_gen: v7x
topology: tpu7x:2x2x1
jax: 0.10.0
libtpu: 0.0.40
codegen_flags: <defaults>
</compile_context>

<pallas_src>
import functools

import jax
import jax.numpy as jnp
from jax.experimental import pallas as pl
from jax.experimental.pallas import tpu as pltpu


def _round_up(n, m):
    return ((n + m - 1) // m) * m


# ----------------------------------------------------------------------------
# Pallas kernel: one grid step == one source's full "infer" pass.
# ----------------------------------------------------------------------------
def _mddn_fused_kernel(
    patches_ref,   # (BHW, CKK_pad)          im2col patches (resident across sources)
    wconv_ref,     # (1, CKK_pad, F_pad)     conv weight of source s
    bconv_ref,     # (1, 1, F_pad)
    wh_ref,        # (1, F_pad, 2*Hb_pad)    [C1 | E1] fused hidden weight
    bh_ref,        # (1, 1, 2*Hb_pad)
    wtail_ref,     # (1, 2*Hb_pad, 2*CL_pad) block-diag [C2 ; E2] head weight
    btail_ref,     # (1, 1, 2*CL_pad)
    res_ref,       # (1, B, 2*CL_pad)        [out logits | softplus evidence]
    feat_ref,      # (1, B, Hb_pad)          bottleneck feature (padded)
    *, B, HW, Hb_pad, CL_pad,
):
    # mddn_f: conv-as-matmul over im2col patches + ReLU        (BHW, F_pad)
    fmaps = jnp.dot(patches_ref[...], wconv_ref[0],
                    preferred_element_type=jnp.float32) + bconv_ref[0]
    fmaps = jnp.maximum(fmaps, 0.0)

    # mddn_f: global average pool as an in-kernel reduction    (B, F_pad)
    f_pooled = jnp.sum(fmaps.reshape(B, HW, -1), axis=1) * (1.0 / HW)

    # mddn_C1 || mddn_E1 fused: Linear + ReLU                  (B, 2*Hb_pad)
    h = jnp.dot(f_pooled, wh_ref[0],
                preferred_element_type=jnp.float32) + bh_ref[0]
    h = jnp.maximum(h, 0.0)
    feat_ref[0] = h[:, :Hb_pad]          # real feature lives in first Hb columns

    # mddn_C2 / mddn_E2 fused (block-diagonal weights)         (B, 2*CL_pad)
    tail = jnp.dot(h, wtail_ref[0],
                   preferred_element_type=jnp.float32) + btail_ref[0]

    # Softplus (stable) only on the evidence half (lanes >= CL_pad); logits raw.
    softplus = jnp.maximum(tail, 0.0) + jnp.log1p(jnp.exp(-jnp.abs(tail)))
    col = jax.lax.broadcasted_iota(jnp.int32, tail.shape, 1)
    res_ref[0] = jnp.where(col >= CL_pad, softplus, tail)


# ----------------------------------------------------------------------------
# Wrapper: im2col + weight packing + single fused pallas_call.
# ----------------------------------------------------------------------------
def _im2col(x_nchw, K=3):
    B, C, H, W = x_nchw.shape
    x = jnp.transpose(x_nchw, (0, 2, 3, 1)).astype(jnp.float32)        # NHWC
    xp = jnp.pad(x, ((0, 0), (1, 1), (1, 1), (0, 0)))
    patches = jnp.concatenate(
        [xp[:, kh:kh + H, kw:kw + W, :] for kh in range(K) for kw in range(K)],
        axis=-1,
    ).reshape(B * H * W, C * K * K)                                     # (BHW, C*K*K)
    return patches


def _pack_source(p, CKK, F, Hb, classes, CKK_pad, F_pad, Hb_pad, CL_pad):
    """Zero-pad & fuse one source's weights into lane-dense matmul matrices."""
    wconv = jnp.zeros((CKK_pad, F_pad), jnp.float32).at[:CKK, :F].set(p["wconv"])
    bconv = jnp.zeros((1, F_pad), jnp.float32).at[:, :F].set(p["bconv"])
    wh = (jnp.zeros((F_pad, 2 * Hb_pad), jnp.float32)
          .at[:F, :Hb].set(p["wc1"])
          .at[:F, Hb_pad:Hb_pad + Hb].set(p["we1"]))
    bh = (jnp.zeros((1, 2 * Hb_pad), jnp.float32)
          .at[:, :Hb].set(p["bc1"])
          .at[:, Hb_pad:Hb_pad + Hb].set(p["be1"]))
    wtail = (jnp.zeros((2 * Hb_pad, 2 * CL_pad), jnp.float32)
             .at[:Hb, :classes].set(p["wc2"])
             .at[Hb_pad:Hb_pad + Hb, CL_pad:CL_pad + classes].set(p["we2"]))
    btail = (jnp.zeros((1, 2 * CL_pad), jnp.float32)
             .at[:, :classes].set(p["bc2"])
             .at[:, CL_pad:CL_pad + classes].set(p["be2"]))
    return wconv, bconv, wh, bh, wtail, btail


def mddn_forward(x_nchw, per_source_params, mode="test", idx=-1, input_mode="x"):
    """Mirrors MDDN.forward: returns (evi, out, features) dicts keyed by source."""
    # `mode` / `input_mode` have no effect for these synthetic submodules
    # (no BatchNorm running statistics to toggle).
    active = [v for v in range(len(per_source_params)) if v != idx]
    evi, out, feats = {}, {}, {}
    if not active:
        return evi, out, feats

    B, C, H, W = x_nchw.shape
    K = 3
    F = per_source_params[active[0]]["wconv"].shape[1]
    Hb = per_source_params[active[0]]["wc1"].shape[1]
    classes = per_source_params[active[0]]["wc2"].shape[1]
    CKK = C * K * K
    HW = H * W
    BHW = B * HW

    # lane-dense padding
    CKK_pad = _round_up(CKK, 128)
    F_pad = _round_up(F, 128)
    Hb_pad = _round_up(Hb, 128)
    CL_pad = _round_up(classes, 128)

    # --- glue: im2col patches, zero-padded contraction dim (pure data movement) ---
    patches = _im2col(x_nchw, K)
    patches = jnp.pad(patches, ((0, 0), (0, CKK_pad - CKK)))            # (BHW, CKK_pad)

    # --- stack padded/fused weights along the source axis ---
    packed = [_pack_source(per_source_params[v], CKK, F, Hb, classes,
                           CKK_pad, F_pad, Hb_pad, CL_pad) for v in active]
    wconv_s = jnp.stack([p[0] for p in packed])      # (S, CKK_pad, F_pad)
    bconv_s = jnp.stack([p[1] for p in packed])      # (S, 1, F_pad)
    wh_s = jnp.stack([p[2] for p in packed])         # (S, F_pad, 2*Hb_pad)
    bh_s = jnp.stack([p[3] for p in packed])         # (S, 1, 2*Hb_pad)
    wtail_s = jnp.stack([p[4] for p in packed])      # (S, 2*Hb_pad, 2*CL_pad)
    btail_s = jnp.stack([p[5] for p in packed])      # (S, 1, 2*CL_pad)

    n_src = len(active)
    kernel = functools.partial(_mddn_fused_kernel,
                               B=B, HW=HW, Hb_pad=Hb_pad, CL_pad=CL_pad)

    res, feat_slab = pl.pallas_call(
        kernel,
        out_shape=(
            jax.ShapeDtypeStruct((n_src, B, 2 * CL_pad), jnp.float32),   # [out | evi]
            jax.ShapeDtypeStruct((n_src, B, Hb_pad), jnp.float32),       # feature slab
        ),
        grid=(n_src,),
        in_specs=[
            # patches: constant block index -> fetched once, resident across sources
            pl.BlockSpec((BHW, CKK_pad), lambda s: (0, 0)),
            pl.BlockSpec((1, CKK_pad, F_pad), lambda s: (s, 0, 0)),
            pl.BlockSpec((1, 1, F_pad), lambda s: (s, 0, 0)),
            pl.BlockSpec((1, F_pad, 2 * Hb_pad), lambda s: (s, 0, 0)),
            pl.BlockSpec((1, 1, 2 * Hb_pad), lambda s: (s, 0, 0)),
            pl.BlockSpec((1, 2 * Hb_pad, 2 * CL_pad), lambda s: (s, 0, 0)),
            pl.BlockSpec((1, 1, 2 * CL_pad), lambda s: (s, 0, 0)),
        ],
        out_specs=(
            pl.BlockSpec((1, B, 2 * CL_pad), lambda s: (s, 0, 0)),
            pl.BlockSpec((1, B, Hb_pad), lambda s: (s, 0, 0)),
        ),
        compiler_params=pltpu.CompilerParams(
            # source axis is embarrassingly parallel -> both TCs on v7x
            dimension_semantics=("parallel",),
        ),
    )(patches, wconv_s, bconv_s, wh_s, bh_s, wtail_s, btail_s)

    for j, v in enumerate(active):
        out[v] = res[j, :, :classes]
        evi[v] = res[j, :, CL_pad:CL_pad + classes]
        feats[v] = feat_slab[j, :, :Hb]
    return evi, out, feats


# ----------------------------------------------------------------------------
# Deterministic parameter construction + pure-JAX reference check.
# ----------------------------------------------------------------------------
def make_params(key, c_in, k, f, hb, classes):
    ks = jax.random.split(key, 10)
    s = lambda fan_in: 1.0 / jnp.sqrt(jnp.float32(fan_in))
    return {
        "wconv": jax.random.normal(ks[0], (c_in * k * k, f), jnp.float32) * s(c_in * k * k),
        "bconv": jax.random.normal(ks[1], (1, f), jnp.float32) * 0.01,
        "wc1":   jax.random.normal(ks[2], (f, hb), jnp.float32) * s(f),
        "bc1":   jax.random.normal(ks[3], (1, hb), jnp.float32) * 0.01,
        "wc2":   jax.random.normal(ks[4], (hb, classes), jnp.float32) * s(hb),
        "bc2":   jax.random.normal(ks[5], (1, classes), jnp.float32) * 0.01,
        "we1":   jax.random.normal(ks[6], (f, hb), jnp.float32) * s(f),
        "be1":   jax.random.normal(ks[7], (1, hb), jnp.float32) * 0.01,
        "we2":   jax.random.normal(ks[8], (hb, classes), jnp.float32) * s(hb),
        "be2":   jax.random.normal(ks[9], (1, classes), jnp.float32) * 0.01,
    }


def mddn_infer_ref(x_nchw, p):
    """Pure-JAX reference with identical math (correctness check)."""
    B, C, H, W = x_nchw.shape
    patches = _im2col(x_nchw, 3)
    fmaps = jnp.maximum(patches @ p["wconv"] + p["bconv"], 0.0)
    f_pooled = jnp.mean(fmaps.reshape(B, H * W, -1), axis=1)
    feat = jnp.maximum(f_pooled @ p["wc1"] + p["bc1"], 0.0)
    out = feat @ p["wc2"] + p["bc2"]
    e1 = jnp.maximum(f_pooled @ p["we1"] + p["be1"], 0.0)
    z = e1 @ p["we2"] + p["be2"]
    evi = jnp.maximum(z, 0.0) + jnp.log1p(jnp.exp(-jnp.abs(z)))
    return out, evi, feat


if __name__ == "__main__":
    # small shapes consistent with the module's forward
    B, C_IN, HSP, WSP = 2, 4, 16, 16
    F_CONV, H_BOT, CLASSES, SOURCE = 32, 32, 8, 2

    root = jax.random.PRNGKey(0)
    kx, *kparams = jax.random.split(root, SOURCE + 1)
    x = jax.random.normal(kx, (B, C_IN, HSP, WSP), jnp.float32)   # NCHW like PyTorch
    params = [make_params(kparams[v], C_IN, 3, F_CONV, H_BOT, CLASSES)
              for v in range(SOURCE)]

    evi, out, feats = mddn_forward(x, params, mode="test", idx=-1)
    jax.block_until_ready((evi, out, feats))

    ok = True
    for v in range(SOURCE):
        o_ref, e_ref, f_ref = mddn_infer_ref(x, params[v])
        ok &= bool(jnp.allclose(out[v], o_ref, rtol=1e-3, atol=1e-3))
        ok &= bool(jnp.allclose(evi[v], e_ref, rtol=1e-3, atol=1e-3))
        ok &= bool(jnp.allclose(feats[v], f_ref, rtol=1e-3, atol=1e-3))
        ok &= bool(jnp.all(evi[v] >= 0.0))                 # evidence non-negative
        alpha_v = evi[v] + 1.0                             # MDDN: alpha = evidence + 1
        ok &= bool(jnp.all(jnp.isfinite(alpha_v)))
        ok &= out[v].shape == (B, CLASSES)
        ok &= evi[v].shape == (B, CLASSES)
        ok &= feats[v].shape == (B, H_BOT)

    if ok:
        print("KERNEL_OK")
    else:
        print("KERNEL_MISMATCH")
</pallas_src>

<mosaic_0001>
module attributes {stable_mosaic.version = 11 : i64} {
  func.func @_mddn_fused_kernel(%arg0: i32, %arg1: memref<512x128xf32, #tpu.memory_space<vmem>>, %arg2: memref<1x128x128xf32, #tpu.memory_space<vmem>>, %arg3: memref<1x1x128xf32, #tpu.memory_space<vmem>>, %arg4: memref<1x128x256xf32, #tpu.memory_space<vmem>>, %arg5: memref<1x1x256xf32, #tpu.memory_space<vmem>>, %arg6: memref<1x256x256xf32, #tpu.memory_space<vmem>>, %arg7: memref<1x1x256xf32, #tpu.memory_space<vmem>>, %arg8: memref<1x2x256xf32, #tpu.memory_space<vmem>>, %arg9: memref<1x2x128xf32, #tpu.memory_space<vmem>>) attributes {dimension_semantics = [#tpu.dimension_semantics<parallel>], iteration_bounds = array<i64: 2>, scalar_prefetch = 0 : i64, scratch_operands = 0 : i64, tpu.core_type = #tpu.core_type<tc>, window_params = [{pipeline_mode = #tpu.pipeline_mode<synchronous>, transform_indices = @transform_0, window_bounds = array<i64: 512, 128>}, {transform_indices = @transform_1, window_bounds = array<i64: 1, 128, 128>}, {transform_indices = @transform_2, window_bounds = array<i64: 1, 1, 128>}, {transform_indices = @transform_3, window_bounds = array<i64: 1, 128, 256>}, {transform_indices = @transform_4, window_bounds = array<i64: 1, 1, 256>}, {transform_indices = @transform_5, window_bounds = array<i64: 1, 256, 256>}, {transform_indices = @transform_6, window_bounds = array<i64: 1, 1, 256>}, {transform_indices = @transform_7, window_bounds = array<i64: 1, 2, 256>}, {transform_indices = @transform_8, window_bounds = array<i64: 1, 2, 128>}]} {
    %c0 = arith.constant 0 : index
    %c0_0 = arith.constant 0 : index
    %0 = vector.load %arg1[%c0, %c0_0] : memref<512x128xf32, #tpu.memory_space<vmem>>, vector<512x128xf32>
    %c0_1 = arith.constant 0 : index
    %c0_2 = arith.constant 0 : index
    %c0_3 = arith.constant 0 : index
    %1 = vector.load %arg2[%c0_1, %c0_2, %c0_3] : memref<1x128x128xf32, #tpu.memory_space<vmem>>, vector<1x128x128xf32>
    %2 = vector.shape_cast %1 : vector<1x128x128xf32> to vector<128x128xf32>
    %cst = arith.constant dense<0.000000e+00> : vector<512x128xf32>
    %3 = tpu.matmul %0, %2, %cst {dimension_numbers = #tpu.dot_dimension_numbers<[1], [0], [0], [1], [0, 0, 1, 1], [], []>} : vector<512x128xf32>, vector<128x128xf32>, vector<512x128xf32> -> vector<512x128xf32>
    %c0_4 = arith.constant 0 : index
    %c0_5 = arith.constant 0 : index
    %c0_6 = arith.constant 0 : index
    %4 = vector.load %arg3[%c0_4, %c0_5, %c0_6] : memref<1x1x128xf32, #tpu.memory_space<vmem>>, vector<1x1x128xf32>
    %5 = vector.shape_cast %4 : vector<1x1x128xf32> to vector<1x128xf32>
    %6 = vector.broadcast %5 : vector<1x128xf32> to vector<512x128xf32>
    %7 = arith.addf %3, %6 : vector<512x128xf32>
    %cst_7 = arith.constant 0.000000e+00 : f32
    %8 = vector.broadcast %cst_7 : f32 to vector<512x128xf32>
    %9 = arith.maximumf %7, %8 : vector<512x128xf32>
    %10 = vector.shape_cast %9 : vector<512x128xf32> to vector<2x256x128xf32>
    %cst_8 = arith.constant dense<0.000000e+00> : vector<2x128xf32>
    %11 = vector.multi_reduction <add>, %10, %cst_8 [1] : vector<2x256x128xf32> to vector<2x128xf32>
    %cst_9 = arith.constant 3.906250e-03 : f32
    %12 = vector.broadcast %cst_9 : f32 to vector<2x128xf32>
    %13 = arith.mulf %11, %12 : vector<2x128xf32>
    %c0_10 = arith.constant 0 : index
    %c0_11 = arith.constant 0 : index
    %c0_12 = arith.constant 0 : index
    %14 = vector.load %arg4[%c0_10, %c0_11, %c0_12] : memref<1x128x256xf32, #tpu.memory_space<vmem>>, vector<1x128x256xf32>
    %15 = vector.shape_cast %14 : vector<1x128x256xf32> to vector<128x256xf32>
    %cst_13 = arith.constant dense<0.000000e+00> : vector<2x256xf32>
    %16 = tpu.matmul %13, %15, %cst_13 {dimension_numbers = #tpu.dot_dimension_numbers<[1], [0], [0], [1], [0, 0, 1, 1], [], []>} : vector<2x128xf32>, vector<128x256xf32>, vector<2x256xf32> -> vector<2x256xf32>
    %c0_14 = arith.constant 0 : index
    %c0_15 = arith.constant 0 : index
    %c0_16 = arith.constant 0 : index
    %17 = vector.load %arg5[%c0_14, %c0_15, %c0_16] : memref<1x1x256xf32, #tpu.memory_space<vmem>>, vector<1x1x256xf32>
    %18 = vector.shape_cast %17 : vector<1x1x256xf32> to vector<1x256xf32>
    %19 = vector.broadcast %18 : vector<1x256xf32> to vector<2x256xf32>
    %20 = arith.addf %16, %19 : vector<2x256xf32>
    %cst_17 = arith.constant 0.000000e+00 : f32
    %21 = vector.broadcast %cst_17 : f32 to vector<2x256xf32>
    %22 = arith.maximumf %20, %21 : vector<2x256xf32>
    %23 = vector.extract_strided_slice %22 {offsets = [0, 0], sizes = [2, 128], strides = [1, 1]} : vector<2x256xf32> to vector<2x128xf32>
    %c0_18 = arith.constant 0 : index
    %c0_19 = arith.constant 0 : index
    %c0_20 = arith.constant 0 : index
    %24 = vector.load %arg9[%c0_18, %c0_19, %c0_20] : memref<1x2x128xf32, #tpu.memory_space<vmem>>, vector<1x2x128xf32>
    %25 = vector.shape_cast %24 : vector<1x2x128xf32> to vector<2x128xf32>
    %26 = vector.shape_cast %23 : vector<2x128xf32> to vector<1x2x128xf32>
    tpu.vector_store %arg9[%c0_18, %c0_19, %c0_20], %26 {strides = array<i32>} : memref<1x2x128xf32, #tpu.memory_space<vmem>>, vector<1x2x128xf32>,
    %c0_21 = arith.constant 0 : index
    %c0_22 = arith.constant 0 : index
    %c0_23 = arith.constant 0 : index
    %27 = vector.load %arg6[%c0_21, %c0_22, %c0_23] : memref<1x256x256xf32, #tpu.memory_space<vmem>>, vector<1x256x256xf32>
    %28 = vector.shape_cast %27 : vector<1x256x256xf32> to vector<256x256xf32>
    %cst_24 = arith.constant dense<0.000000e+00> : vector<2x256xf32>
    %29 = tpu.matmul %22, %28, %cst_24 {dimension_numbers = #tpu.dot_dimension_numbers<[1], [0], [0], [1], [0, 0, 1, 1], [], []>} : vector<2x256xf32>, vector<256x256xf32>, vector<2x256xf32> -> vector<2x256xf32>
    %c0_25 = arith.constant 0 : index
    %c0_26 = arith.constant 0 : index
    %c0_27 = arith.constant 0 : index
    %30 = vector.load %arg7[%c0_25, %c0_26, %c0_27] : memref<1x1x256xf32, #tpu.memory_space<vmem>>, vector<1x1x256xf32>
    %31 = vector.shape_cast %30 : vector<1x1x256xf32> to vector<1x256xf32>
    %32 = vector.broadcast %31 : vector<1x256xf32> to vector<2x256xf32>
    %33 = arith.addf %29, %32 : vector<2x256xf32>
    %cst_28 = arith.constant 0.000000e+00 : f32
    %34 = vector.broadcast %cst_28 : f32 to vector<2x256xf32>
    %35 = arith.maximumf %33, %34 : vector<2x256xf32>
    %36 = math.absf %33 : vector<2x256xf32>
    %cst_29 = arith.constant 0.000000e+00 : f32
    %37 = vector.broadcast %cst_29 : f32 to vector<2x256xf32>
    %38 = arith.subf %37, %36 : vector<2x256xf32>
    %39 = math.exp %38 : vector<2x256xf32>
    %40 = math.log1p %39 : vector<2x256xf32>
    %41 = arith.addf %35, %40 : vector<2x256xf32>
    %42 = tpu.iota {dimensions = array<i32: 1>} : vector<2x256xi32>
    %c128_i32 = arith.constant 128 : i32
    %43 = vector.broadcast %c128_i32 : i32 to vector<2x256xi32>
    %44 = arith.cmpi sge, %42, %43 : vector<2x256xi32>
    %45 = arith.select %44, %41, %33 : vector<2x256xi1>, vector<2x256xf32>
    %c0_30 = arith.constant 0 : index
    %c0_31 = arith.constant 0 : index
    %c0_32 = arith.constant 0 : index
    %46 = vector.load %arg8[%c0_30, %c0_31, %c0_32] : memref<1x2x256xf32, #tpu.memory_space<vmem>>, vector<1x2x256xf32>
    %47 = vector.shape_cast %46 : vector<1x2x256xf32> to vector<2x256xf32>
    %48 = vector.shape_cast %45 : vector<2x256xf32> to vector<1x2x256xf32>
    tpu.vector_store %arg8[%c0_30, %c0_31, %c0_32], %48 {strides = array<i32>} : memref<1x2x256xf32, #tpu.memory_space<vmem>>, vector<1x2x256xf32>,
    return
  }
  func.func @transform_0(%arg0: i32) -> (i32, i32) {
    %c0_i32 = arith.constant 0 : i32
    %c0_i32_0 = arith.constant 0 : i32
    %c0_i32_1 = arith.constant 0 : i32
    return %c0_i32, %c0_i32_0 : i32, i32
  }
  func.func @transform_1(%arg0: i32) -> (i32, i32, i32) {
    %c0_i32 = arith.constant 0 : i32
    %c0_i32_0 = arith.constant 0 : i32
    %c0_i32_1 = arith.constant 0 : i32
    return %arg0, %c0_i32, %c0_i32_0 : i32, i32, i32
  }
  func.func @transform_2(%arg0: i32) -> (i32, i32, i32) {
    %c0_i32 = arith.constant 0 : i32
    %c0_i32_0 = arith.constant 0 : i32
    %c0_i32_1 = arith.constant 0 : i32
    return %arg0, %c0_i32, %c0_i32_0 : i32, i32, i32
  }
  func.func @transform_3(%arg0: i32) -> (i32, i32, i32) {
    %c0_i32 = arith.constant 0 : i32
    %c0_i32_0 = arith.constant 0 : i32
    %c0_i32_1 = arith.constant 0 : i32
    return %arg0, %c0_i32, %c0_i32_0 : i32, i32, i32
  }
  func.func @transform_4(%arg0: i32) -> (i32, i32, i32) {
    %c0_i32 = arith.constant 0 : i32
    %c0_i32_0 = arith.constant 0 : i32
    %c0_i32_1 = arith.constant 0 : i32
    return %arg0, %c0_i32, %c0_i32_0 : i32, i32, i32
  }
  func.func @transform_5(%arg0: i32) -> (i32, i32, i32) {
    %c0_i32 = arith.constant 0 : i32
    %c0_i32_0 = arith.constant 0 : i32
    %c0_i32_1 = arith.constant 0 : i32
    return %arg0, %c0_i32, %c0_i32_0 : i32, i32, i32
  }
  func.func @transform_6(%arg0: i32) -> (i32, i32, i32) {
    %c0_i32 = arith.constant 0 : i32
    %c0_i32_0 = arith.constant 0 : i32
    %c0_i32_1 = arith.constant 0 : i32
    return %arg0, %c0_i32, %c0_i32_0 : i32, i32, i32
  }
  func.func @transform_7(%arg0: i32) -> (i32, i32, i32) {
    %c0_i32 = arith.constant 0 : i32
    %c0_i32_0 = arith.constant 0 : i32
    %c0_i32_1 = arith.constant 0 : i32
    return %arg0, %c0_i32, %c0_i32_0 : i32, i32, i32
  }
  func.func @transform_8(%arg0: i32) -> (i32, i32, i32) {
    %c0_i32 = arith.constant 0 : i32
    %c0_i32_0 = arith.constant 0 : i32
    %c0_i32_1 = arith.constant 0 : i32
    return %arg0, %c0_i32, %c0_i32_0 : i32, i32, i32
  }
}

</mosaic_0001>

<bundles_post_ra>
// kernel: tpu_custom_call.1
= control target key start
LH: loop header
LB: loop body
LE: loop exit
PB: predicated region body
PF: predicated region fallthrough
CT: control target
= control target key end

     0   :  { %s2889_s0 = inlined_call_operand.hbm [shape: f32[512,128], index: 0, kind: input, shape index: {}]   ;;  %s2890_s1 = inlined_call_operand.hbm [shape: f32[2,128,128], index: 1, kind: input, shape index: {}]   ;;  %s2891_s2 = inlined_call_operand.vmem [shape: f32[2,1,128], index: 2, kind: input, shape index: {}]   ;;  %s2892_s3 = inlined_call_operand.hbm [shape: f32[2,128,256], index: 3, kind: input, shape index: {}]   ;;  %s2893_s4 = inlined_call_operand.vmem [shape: f32[2,1,256], index: 4, kind: input, shape index: {}]   ;;  %s2894_s5 = inlined_call_operand.hbm [shape: f32[2,256,256], index: 5, kind: input, shape index: {}]   ;;  %s2895_s6 = inlined_call_operand.vmem [shape: f32[2,1,256], index: 6, kind: input, shape index: {}]   ;;  %s2896_s7 = inlined_call_operand.hbm [shape: f32[2,2,256], index: 7, kind: output, shape index: {0}]   ;;  %s2897_s8 = inlined_call_operand.hbm [shape: f32[2,2,128], index: 8, kind: output, shape index: {1}]  }
   0x1   :  { %2915 = sst [smem:[#allocation23_spill]] %s2890_s1 }
   0x2   :  { %2916 = sst [smem:[#allocation24_spill]] %s2896_s7 }
   0x3   :  { %14 = vsyncpa [#allocation3], 0 }
   0x4   :  { %15 = vsyncpa [#allocation6], 0 }
   0x5   :  { %17 = vsyncpa [#allocation6 + $0x1], 0 }
   0x6   :  { %18 = vsyncpa [#allocation9], 0 }
   0x7   :  { %20 = vsyncpa [#allocation9 + $0x1], 0 }
   0x8   :  { %21 = vsyncpa [#allocation4], 0 }
   0x9   :  { %23 = vsyncpa [#allocation4 + $0x1], 0 }
   0xa   :  { %24 = vsyncpa [#allocation12], 0 }
   0xb   :  { %26 = vsyncpa [#allocation12 + $0x1], 0  ;;  %s2363_s27 = smov 0   ;;  %s2365_s28 = smov 0  }
   0xc   :  { %s2367_s29 = smov 0   ;;  %s2369_s30 = smov 0  }
   0xd LB: > { %2917 = sst [smem:[#allocation18_spill]] %s2293_s27  ;;  %s2384_s9 = sadd.s32 1, %s2305_s30   ;;  %s2305_s30 = sphi %s2369_s30, %s2945_s30   ;;  %s2301_s29 = sphi %s2367_s29, %s2947_s29   ;;  %s2297_s28 = sphi %s2365_s28, %s2949_s28   ;;  %s2293_s27 = sphi %s2363_s27, %s2948_s27  }
   0xe   : > { %2918 = sst [smem:[#allocation19_spill]] %s2301_s29  ;;  %s60_s10 = sadd.s32 1, %s2301_s29 }
   0xf   : > { %2919 = sst [smem:[#allocation20_spill]] %s2384_s9  ;;  %s57_s11 = ssub.s32 %s2305_s30, %s2384_s9 }
  0x10   : > { %p2898_p0 = scmp.ne.s32.totalorder %s2301_s29, %s2297_s28  ;;  %p58_p1 = scmp.eq.s32.totalorder %s57_s11, 0 }
  0x11   : > { %p68_p2 = scmp.eq.s32.totalorder %s2305_s30, 0  ;;  %p2036_p5 = scmp.lt.s32.totalorder %s2305_s30, 2 }
  0x12   : > { %s2393_s12 = scalar_select %p58_p1, %s2301_s29, %s60_s10  }
  0x13   : > { %p69_p3 = por %p68_p2, %p2898_p0  ;;  %s292_s13 = sand.u32 1, %s2305_s30  }
  0x14   : > { %2920 = sst [smem:[#allocation21_spill]] %s2393_s12  ;;  %s2402_s14 = sand.u32 1, %s2301_s29  }
  0x15   : > { %s1633_s15 = sshll.u32 %s2402_s14, 7  ;;  %s1660_s16 = sshll.u32 %s2305_s30, 11 }
  0x16   : > { %s2921_s1 = sld [smem:[#allocation23_spill]]  ;;  %s296_s20 = scalar_lea.vmem [#allocation5], %s1633_s15 }
  0x17   : > { %s303_s21 = sshll.u32 %s296_s20, 4  ;;  %p2411_p6 = pnand %p2036_p5, %p69_p3  ;;  %s2415_s21 = int_to_ptr.vmem [resolvable:$true] %s303_s21 }
  0x18   : > { %s2417_s23 = scalar_lea.sflag [#allocation6], %s292_s13 }
  0x19   : > { %s2922_s22 = scalar_select %p2411_p6, 1, 0 }
  0x1a   : > { %p2423_p8 = pneg %p2411_p6 }
  0x1c   : > { %s2409_s19 = scalar_lea.hbm %s2921_s1, %s1660_s16  ;;  %s2086_s11 = scalar_lea.hbm %s2921_s1, 4096 }
  0x1d   : > { %s2081_s24 = scalar_lea.hbm %s2409_s19, 2048  ;;  %p2087_p11 = scmp.lt.u32.totalorder %s2409_s19, %s2921_s1 }
  0x1e   : > { %p2082_p7 = scmp.ne.s32.totalorder %s2409_s19, %s2081_s24  ;;  %p2088_p12 = scmp.lt.u32.totalorder %s2086_s11, %s2081_s24 }
  0x1f   : > { %s2923_s25 = scalar_select %p2423_p8, 1, 0 }
  0x20   : > { %p2084_p9 = pnand %p2423_p8, %p2082_p7  ;;  %p2089_p13 = por %p2088_p12, %p2087_p11 }
  0x21   : > { %p2090_p1 = scmp.lt.u32.totalorder %s2081_s24, %s2409_s19 }
  0x22   : > { %p2085_p10 = pneg %p2084_p9 }
  0x23   : > { %p2091_p2 = por %p2090_p1, %p2089_p13 }
  0x25   : > { %p2092_p3 = pnand %p2091_p2, %p2085_p10 }
  0x27   : > { %2095 = shalt.err (!%p2092_p3)
}
  0x28   : > { %s2096_s13 = scalar_lea.vmem %s2415_s21, 2048  ;;  %s2307_s17 = smov [#allocation5]  }
  0x29   : > { %p2097_p5 = scmp.ne.s32.totalorder %s2415_s21, %s2096_s13  ;;  %s2101_s18 = sshll.u32 %s2307_s17, 4  ;;  %s2102_s18 = int_to_ptr.vmem [resolvable:$false] %s2101_s18 }
  0x2a   : > { %s2103_s20 = scalar_lea.vmem %s2102_s18, 4096  ;;  %p2104_p4 = scmp.lt.s32.totalorder %s2415_s21, %s2102_s18 }
  0x2b   : > { %p2099_p7 = pnand %p2097_p5, %p2423_p8  ;;  %p2105_p0 = scmp.lt.s32.totalorder %s2103_s20, %s2096_s13 }
  0x2d   : > { %p2100_p9 = pneg %p2099_p7  ;;  %p2106_p11 = por %p2105_p0, %p2104_p4 }
  0x2f   : > { %p2107_p12 = pnand %p2106_p11, %p2100_p9 }
  0x31   : > { %2110 = shalt.err (!%p2107_p12)
}
  0x32   : > { %s2899_s24 = smov 128   ;;  %s2900_s26 = smov 8  }
  0x33   : > { %2021 = dma.hbm_to_vmem [thread:$0]  (!%p2411_p6), %s2409_s19, 2048, %s2415_s21, %s2417_s23, %s2899_s24, %s2899_s24, %s2900_s26  }
  0x34   : > { %s2451_s10 = sadd.s32 4294967295, %s2305_s30   ;;  %s1629_s11 = sadd.s32 4294967294, %s2305_s30  }
  0x35   : > { %p73_p0 = scmp.ne.s32.totalorder %s2297_s28, %s2293_s27  ;;  %p2907_p4 = scmp.eq.s32.totalorder %s2451_s10, 0 }
  0x36   : > { %p227_p10 = scmp.eq.s32.totalorder %s2451_s10, 1  ;;  %p233_p13 = scmp.eq.s32.totalorder %s1629_s11, 1 }
  0x37   : > { %p2460_p1 = por %p2907_p4, %p73_p0  ;;  %p1630_p2 = scmp.ge.s32.totalorder %s2305_s30, 1 }
  0x38   : > { %p2925_p3 = scmp.ne.s32.totalorder %s2301_s29, %s2297_s28  ;;  %p2472_p7 = por %p233_p13, %p73_p0 }
  0x39   : > { %s2924_s15 = scalar_select %p2460_p1, 1, 0 }
  0x3a   : > { %p2468_p5 = por %p227_p10, %p2925_p3  ;;  %p266_p9 = scmp.lt.s32.totalorder %s2305_s30, 3 }
  0x3b   : > { %s2927_s21 = scalar_select %p2472_p7, 1, 0 }
  0x3c   : > { %s2926_s19 = scalar_select %p2468_p5, 1, 0 }
  0x3d   : > { %2928 = sst [smem:[#allocation22_spill]] %s2927_s21  ;;  %s1636_s16 = sshll.u32 %s2402_s14, 8 }
  0x3e   : > { %p2478_p11 = pnand %p1630_p2, %p266_p9  ;;  %s2310_s17 = smov [#allocation2]  }
  0x3f   : > { %s278_s18 = sshll.u32 %s2310_s17, 4  ;;  %s1661_s20 = sshll.u32 %s2305_s30, 12  ;;  %s279_s18 = int_to_ptr.vmem [resolvable:$true] %s278_s18 }
  0x40   : > { %s2929_s13 = scalar_select %p2478_p11, 1, 0 }
  0x41   : > { %p2014_p12 = pneg %p2478_p11  ;;  %s2488_s26 = scalar_lea.hbm %s2892_s3, %s1661_s20 }
  0x42   : > { %s323_s1 = scalar_lea.vmem [#allocation7], %s1636_s16  ;;  %s2111_s21 = scalar_lea.hbm %s2889_s0, 8192 }
  0x43   : > { %s330_s12 = sshll.u32 %s323_s1, 4  ;;  %p2492_p0 = pnand %p2014_p12, %p2907_p4  ;;  %s2496_s12 = int_to_ptr.vmem [resolvable:$true] %s330_s12 }
  0x44   : > { %p2112_p10 = scmp.ne.s32.totalorder %s2889_s0, %s2111_s21  ;;  %p2118_p9 = scmp.lt.u32.totalorder %s2111_s21, %s2889_s0 }
  0x45   : > { %p2113_p13 = pneg %p2492_p0 }
  0x47   : > { %p2114_p2 = pnand %p2113_p13, %p2112_p10 }
  0x49   : > { %p2115_p3 = pneg %p2114_p2 }
  0x4b   : > { %p2120_p12 = pnand %p2118_p9, %p2115_p3 }
  0x4d   : > { %2123 = shalt.err (!%p2120_p12)
}
  0x4e   : > { %s2124_s16 = scalar_lea.vmem %s279_s18, 8192  ;;  %p2132_p1 = scmp.lt.s32.totalorder %s279_s18, %s279_s18 }
  0x4f   : > { %p2125_p4 = scmp.ne.s32.totalorder %s279_s18, %s2124_s16  ;;  %p2133_p11 = scmp.lt.s32.totalorder %s2124_s16, %s2124_s16 }
  0x51   : > { %p2127_p7 = pnand %p2125_p4, %p2113_p13  ;;  %p2134_p6 = por %p2133_p11, %p2132_p1 }
  0x53   : > { %p2128_p5 = pneg %p2127_p7 }
  0x55   : > { %p2135_p8 = pnand %p2134_p6, %p2128_p5 }
  0x57   : > { %2138 = shalt.err (!%p2135_p8)
}
  0x58   : > { %s2931_s7 = smov 8   ;;  %s2932_s27 = smov 128  }
  0x59   : > { %2017 = dma.hbm_to_vmem [thread:$0]  (!%p2492_p0), %s2889_s0, 8192, %s279_s18, [#allocation3], %s2932_s27, %s2932_s27, %s2931_s7  }
  0x5a   : > { %s2139_s21 = scalar_lea.hbm %s2488_s26, 4096  ;;  %p2933_p7 = scmp.ne.s32.totalorder %s2923_s25, 0 }
  0x5b   : > { %p2140_p4 = scmp.ne.s32.totalorder %s2488_s26, %s2139_s21  ;;  %s2144_s29 = scalar_lea.hbm %s2892_s3, 8192 }
  0x5c   : > { %p2145_p8 = scmp.lt.u32.totalorder %s2488_s26, %s2892_s3  ;;  %p2146_p5 = scmp.lt.u32.totalorder %s2144_s29, %s2139_s21 }
  0x5d   : > { %p2142_p1 = pnand %p2140_p4, %p2933_p7  ;;  %p2148_p10 = scmp.lt.u32.totalorder %s2139_s21, %s2488_s26 }
  0x5e   : > { %p2147_p11 = por %p2146_p5, %p2145_p8 }
  0x5f   : > { %p2143_p6 = pneg %p2142_p1 }
  0x60   : > { %p2149_p13 = por %p2148_p10, %p2147_p11 }
  0x62   : > { %p2150_p2 = pnand %p2149_p13, %p2143_p6 }
  0x64   : > { %2153 = shalt.err (!%p2150_p2)
}
  0x65   : > { %s2154_s18 = scalar_lea.vmem %s2496_s12, 4096  ;;  %s2311_s16 = smov [#allocation7]  }
  0x66   : > { %p2155_p0 = scmp.ne.s32.totalorder %s2496_s12, %s2154_s18  ;;  %s2159_s7 = sshll.u32 %s2311_s16, 4  ;;  %s2160_s7 = int_to_ptr.vmem [resolvable:$false] %s2159_s7 }
  0x67   : > { %s2161_s27 = scalar_lea.vmem %s2160_s7, 8192  ;;  %p2162_p12 = scmp.lt.s32.totalorder %s2496_s12, %s2160_s7 }
  0x68   : > { %p2157_p3 = pnand %p2155_p0, %p2933_p7  ;;  %p2163_p4 = scmp.lt.s32.totalorder %s2161_s27, %s2154_s18 }
  0x6a   : > { %p2158_p9 = pneg %p2157_p3  ;;  %p2164_p1 = por %p2163_p4, %p2162_p12 }
  0x6c   : > { %p2165_p8 = pnand %p2164_p1, %p2158_p9 }
  0x6e   : > { %2168 = shalt.err (!%p2165_p8)
}
  0x6f   : > { %s2312_s9 = smov 256   ;;  %s2313_s20 = smov 16  }
  0x70   : > { %p2934_p6 = scmp.ne.s32.totalorder %s2922_s22, 0  ;;  %s1639_s21 = sshll.u32 %s2402_s14, 9 }
  0x71   : > { %s1662_s11 = sshll.u32 %s2305_s30, 13  ;;  %s351_s24 = scalar_lea.vmem [#allocation8], %s1639_s21 }
  0x72   : > { %2024 = dma.hbm_to_vmem [thread:$0]  (!%p2934_p6), %s2488_s26, 4096, %s2496_s12, %s2417_s23, %s2312_s9, %s2312_s9, %s2313_s20  }
  0x73   : > { %s2547_s1 = scalar_lea.hbm %s2894_s5, %s1662_s11  ;;  %s358_s18 = sshll.u32 %s351_s24, 4  ;;  %s2549_s18 = int_to_ptr.vmem [resolvable:$true] %s358_s18 }
  0x74   : > { %s348_s16 = scalar_lea.sflag [#allocation9], %s2402_s14  ;;  %s2169_s7 = scalar_lea.hbm %s2547_s1, 8192 }
  0x75   : > { %p2170_p5 = scmp.ne.s32.totalorder %s2547_s1, %s2169_s7  ;;  %s2174_s26 = scalar_lea.hbm %s2894_s5, 16384 }
  0x76   : > { %p2175_p13 = scmp.lt.u32.totalorder %s2547_s1, %s2894_s5  ;;  %p2176_p2 = scmp.lt.u32.totalorder %s2174_s26, %s2169_s7 }
  0x77   : > { %p2172_p11 = pnand %p2170_p5, %p2933_p7  ;;  %p2178_p3 = scmp.lt.u32.totalorder %s2169_s7, %s2547_s1 }
  0x78   : > { %p2177_p0 = por %p2176_p2, %p2175_p13 }
  0x79   : > { %p2173_p10 = pneg %p2172_p11 }
  0x7a   : > { %p2179_p9 = por %p2178_p3, %p2177_p0 }
  0x7c   : > { %p2180_p12 = pnand %p2179_p9, %p2173_p10 }
  0x7e   : > { %2183 = shalt.err (!%p2180_p12)
}
  0x7f   : > { %s2184_s21 = scalar_lea.vmem %s2549_s18, 8192  ;;  %s2314_s17 = smov [#allocation8]  }
  0x80   : > { %p2185_p4 = scmp.ne.s32.totalorder %s2549_s18, %s2184_s21  ;;  %s2189_s29 = sshll.u32 %s2314_s17, 4  ;;  %s2190_s29 = int_to_ptr.vmem [resolvable:$false] %s2189_s29 }
  0x81   : > { %s2191_s24 = scalar_lea.vmem %s2190_s29, 16384  ;;  %p2192_p5 = scmp.lt.s32.totalorder %s2549_s18, %s2190_s29 }
  0x82   : > { %p2187_p1 = pnand %p2185_p4, %p2933_p7  ;;  %p2193_p11 = scmp.lt.s32.totalorder %s2191_s24, %s2184_s21 }
  0x84   : > { %p2188_p8 = pneg %p2187_p1  ;;  %p2194_p13 = por %p2193_p11, %p2192_p5 }
  0x86   : > { %p2195_p2 = pnand %p2194_p13, %p2188_p8 }
  0x88   : > { %2198 = shalt.err (!%p2195_p2)
}
  0x89   : > { %2027 = dma.hbm_to_vmem [thread:$0]  (!%p2934_p6), %s2547_s1, 8192, %s2549_s18, %s348_s16, %s2312_s9, %s2312_s9, %s2313_s20  }
  0x8a   : > { %p2935_p7 = scmp.ne.s32.totalorder %s2929_s13, 0 }
  0x8b   : > { %p2936_p10 = scmp.eq.s32.totalorder (!%p2935_p7), %s2451_s10, 0 }
  0x8c   : > { %377 = sbr.rel (%p2935_p7) target bundleno = 1036 (0x40c), region = 48 }
  0x93   : > { %2272 = dma.done.wait (%p2936_p10), [#allocation3], 8192   ;;  %p2937_p0 = pmov %p2936_p10 }
  0x94   : > { %s383_s22 = sand.u32 1, %s2451_s10   ;;  %s2586_s25 = sand.u32 1, %s2297_s28  }
  0x95   : > { %2274 = vsyncadd (%p2937_p0), [#allocation3], 4294959104  ;;  %s1644_s14 = sshll.u32 %s2586_s25, 7  ;;  %s384_s7 = scalar_lea.sflag [#allocation6], %s383_s22 }
  0x96   : > { %s2589_s12 = scalar_lea.vmem [#allocation5], %s1644_s14  ;;  %p2938_p6 = scmp.ne.s32.totalorder %s2924_s15, 0 }
  0x98   : > { %2276 = dma.done.wait (%p2938_p6), %s384_s7, 6144  }
  0x99   : > { %2278 = vsyncadd (%p2938_p6), %s384_s7, 4294961152  ;;  %s1645_s13 = sshll.u32 %s2586_s25, 8  ;;  %s1646_s9 = sshll.u32 %s2586_s25, 9 }
  0x9a   : > { %s2597_s20 = scalar_lea.vmem [#allocation7], %s1645_s13  ;;  %s402_s1 = scalar_lea.sflag [#allocation9], %s2586_s25 }
  0x9b   : > { %s2600_s18 = scalar_lea.vmem [#allocation8], %s1646_s9 }
  0x9c   : > { %2280 = dma.done.wait (%p2938_p6), %s402_s1, 8192  }
  0x9d   : > { %2282 = vsyncadd (%p2938_p6), %s402_s1, 4294959104  ;;  %v539_v0 = vld [vmem:[%s2589_s12] sm:$0xff]  ;;  %v540_v1 = vld [vmem:[%s2589_s12 + $0x8] sm:$0xff]  ;;  %p464_p3 = scmp.lt.s32.totalorder %s2451_s10, 1  ;;  %vm1133_vm0 = vcmask 1041409   ;;  %s1648_s29 = sshll.u32 %s2586_s25, 1 }
  0x9e   : > { %v541_v2 = vld [vmem:[%s2589_s12 + $0x10] sm:$0xff]  ;;  %v1872_v3 = vpack.c.bf16 %v540_v1, %v539_v0  ;;  %v542_v4 = vld [vmem:[%s2589_s12 + $0x18] sm:$0xff]  ;;  %v543_v6 = vld [vmem:[%s2589_s12 + $0x20] sm:$0xff]  ;;  %s463_s24 = scalar_lea.vmem [#allocation11], %s1648_s29  ;;  %s1657_s22 = sshll.u32 %s2451_s10, 5 }
  0x9f   : > { %v1876_v5 = vpack.c.bf16 %v542_v4, %v541_v2  ;;  %v544_v7 = vld [vmem:[%s2589_s12 + $0x28] sm:$0xff]  ;;  %v475_v9 = vld [vmem:[#allocation2] sm:$0xff]  ;;  %v545_v10 = vld [vmem:[%s2589_s12 + $0x30] sm:$0xff]  ;;  %s2630_s15 = scalar_select %p464_p3, %s2451_s10, 1 }
  0xa0   : > { %1873 = vmatprep.subr.bf16.mxu0 %v1872_v3  ;;  %v1880_v8 = vpack.c.bf16 %v544_v7, %v543_v6  ;;  %v546_v11 = vld [vmem:[%s2589_s12 + $0x38] sm:$0xff]  ;;  %1776 = vmatprep.mubr.f32.mxu0 %v475_v9  ;;  %v547_v13 = vld [vmem:[%s2589_s12 + $0x40] sm:$0xff]  ;;  %v548_v14 = vld [vmem:[%s2589_s12 + $0x48] sm:$0xff]  ;;  %s1439_s14 = sshll.u32 %s463_s24, 4  ;;  %s2813_s13 = scalar_lea.hbm %s2897_s8, %s1657_s22  ;;  %s1440_s14 = int_to_ptr.vmem [resolvable:$true] %s1439_s14 }
  0xa1   : > { %1875 = vmatpush3.bf16.msra.mxu0 %v1872_v3  ;;  %v1884_v12 = vpack.c.bf16 %v546_v11, %v545_v10  ;;  %v1888_v15 = vpack.c.bf16 %v548_v14, %v547_v13  ;;  %v549_v16 = vld [vmem:[%s2589_s12 + $0x50] sm:$0xff]  ;;  %v550_v17 = vld [vmem:[%s2589_s12 + $0x58] sm:$0xff]  ;;  %v551_v19 = vld [vmem:[%s2589_s12 + $0x60] sm:$0xff]  ;;  %s466_s26 = scalar_lea.vmem %s2891_s2, %s2630_s15  ;;  %s1649_s27 = sshll.u32 %s2630_s15, 1 }
  0xa2   : > { %1877 = vmatprep.subr.bf16.mxu0 %v1876_v5  ;;  %v1892_v18 = vpack.c.bf16 %v550_v17, %v549_v16  ;;  %v552_v20 = vld [vmem:[%s2589_s12 + $0x68] sm:$0xff]  ;;  %v553_v22 = vld [vmem:[%s2589_s12 + $0x70] sm:$0xff]  ;;  %v554_v23 = vld [vmem:[%s2589_s12 + $0x78] sm:$0xff]  ;;  %s470_s17 = scalar_lea.vmem %s2893_s4, %s1649_s27  ;;  %s1412_s9 = scalar_lea.sflag [#allocation12], %s2586_s25 }
  0xa3   : > { %v1896_v21 = vpack.c.bf16 %v552_v20, %v551_v19  ;;  %v1900_v24 = vpack.c.bf16 %v554_v23, %v553_v22  ;;  %v476_v25 = vld [vmem:[#allocation2 + $0x8] sm:$0xff]  ;;  %v477_v26 = vld [vmem:[#allocation2 + $0x10] sm:$0xff]  ;;  %v478_v27 = vld [vmem:[#allocation2 + $0x18] sm:$0xff]  ;;  %p2939_p12 = scmp.ne.s32.totalorder %s2926_s19, 0  ;;  %s2316_s1 = smov [#allocation11]  }
  0xa4   : > { %v479_v28 = vld [vmem:[#allocation2 + $0x20] sm:$0xff]  ;;  %v480_v29 = vld [vmem:[#allocation2 + $0x28] sm:$0xff]  ;;  %v481_v30 = vld [vmem:[#allocation2 + $0x30] sm:$0xff] }
  0xa5   : > { %1879 = vmatpush3.bf16.msra.mxu0 %v1876_v5  ;;  %v482_v31 = vld [vmem:[#allocation2 + $0x38] sm:$0xff]  ;;  %v483_v32 = vld [vmem:[#allocation2 + $0x40] sm:$0xff]  ;;  %v484_v33 = vld [vmem:[#allocation2 + $0x48] sm:$0xff] }
  0xa6   : > { %1881 = vmatprep.subr.bf16.mxu0 %v1880_v8  ;;  %v485_v34 = vld [vmem:[#allocation2 + $0x50] sm:$0xff]  ;;  %v486_v35 = vld [vmem:[#allocation2 + $0x58] sm:$0xff]  ;;  %v487_v36 = vld [vmem:[#allocation2 + $0x60] sm:$0xff] }
  0xa7   : > { %v488_v37 = vld [vmem:[#allocation2 + $0x68] sm:$0xff]  ;;  %v489_v38 = vld [vmem:[#allocation2 + $0x70] sm:$0xff]  ;;  %v490_v39 = vld [vmem:[#allocation2 + $0x78] sm:$0xff] }
  0xa8   : > { %v491_v40 = vld [vmem:[#allocation2 + $0x80] sm:$0xff]  ;;  %v492_v41 = vld [vmem:[#allocation2 + $0x88] sm:$0xff]  ;;  %v493_v42 = vld [vmem:[#allocation2 + $0x90] sm:$0xff] }
  0xa9   : > { %1883 = vmatpush3.bf16.msra.mxu0 %v1880_v8  ;;  %v494_v43 = vld [vmem:[#allocation2 + $0x98] sm:$0xff]  ;;  %v495_v44 = vld [vmem:[#allocation2 + $0xa0] sm:$0xff]  ;;  %v496_v45 = vld [vmem:[#allocation2 + $0xa8] sm:$0xff] }
  0xaa   : > { %1885 = vmatprep.subr.bf16.mxu0 %v1884_v12  ;;  %v497_v46 = vld [vmem:[#allocation2 + $0xb0] sm:$0xff]  ;;  %v498_v47 = vld [vmem:[#allocation2 + $0xb8] sm:$0xff]  ;;  %v499_v48 = vld [vmem:[#allocation2 + $0xc0] sm:$0xff] }
  0xab   : > { %v500_v49 = vld [vmem:[#allocation2 + $0xc8] sm:$0xff]  ;;  %v501_v50 = vld [vmem:[#allocation2 + $0xd0] sm:$0xff]  ;;  %v502_v51 = vld [vmem:[#allocation2 + $0xd8] sm:$0xff] }
  0xac   : > { %v503_v52 = vld [vmem:[#allocation2 + $0xe0] sm:$0xff]  ;;  %v504_v53 = vld [vmem:[#allocation2 + $0xe8] sm:$0xff]  ;;  %v505_v54 = vld [vmem:[#allocation2 + $0xf0] sm:$0xff] }
  0xad   : > { %1887 = vmatpush3.bf16.msra.mxu0 %v1884_v12  ;;  %v506_v55 = vld [vmem:[#allocation2 + $0xf8] sm:$0xff]  ;;  %v507_v56 = vld [vmem:[#allocation2 + $0x100] sm:$0xff]  ;;  %v508_v57 = vld [vmem:[#allocation2 + $0x108] sm:$0xff] }
  0xae   : > { %1889 = vmatprep.subr.bf16.mxu0 %v1888_v15  ;;  %v509_v58 = vld [vmem:[#allocation2 + $0x110] sm:$0xff]  ;;  %v510_v59 = vld [vmem:[#allocation2 + $0x118] sm:$0xff]  ;;  %v511_v60 = vld [vmem:[#allocation2 + $0x120] sm:$0xff] }
  0xaf   : > { %v512_v61 = vld [vmem:[#allocation2 + $0x128] sm:$0xff]  ;;  %v513_v62 = vld [vmem:[#allocation2 + $0x130] sm:$0xff]  ;;  %v514_v63 = vld [vmem:[#allocation2 + $0x138] sm:$0xff] }
  0xb0   : > { %v515_v0 = vld [vmem:[#allocation2 + $0x140] sm:$0xff]  ;;  %v516_v1 = vld [vmem:[#allocation2 + $0x148] sm:$0xff]  ;;  %v517_v2 = vld [vmem:[#allocation2 + $0x150] sm:$0xff] }
  0xb1   : > { %1891 = vmatpush3.bf16.msra.mxu0 %v1888_v15  ;;  %v518_v3 = vld [vmem:[#allocation2 + $0x158] sm:$0xff]  ;;  %v519_v4 = vld [vmem:[#allocation2 + $0x160] sm:$0xff]  ;;  %v520_v5 = vld [vmem:[#allocation2 + $0x168] sm:$0xff] }
  0xb2   : > { %1893 = vmatprep.subr.bf16.mxu0 %v1892_v18  ;;  %v521_v6 = vld [vmem:[#allocation2 + $0x170] sm:$0xff]  ;;  %v522_v7 = vld [vmem:[#allocation2 + $0x178] sm:$0xff]  ;;  %v523_v8 = vld [vmem:[#allocation2 + $0x180] sm:$0xff] }
  0xb3   : > { %v524_v9 = vld [vmem:[#allocation2 + $0x188] sm:$0xff]  ;;  %v525_v10 = vld [vmem:[#allocation2 + $0x190] sm:$0xff]  ;;  %v526_v11 = vld [vmem:[#allocation2 + $0x198] sm:$0xff] }
  0xb4   : > { %v527_v12 = vld [vmem:[#allocation2 + $0x1a0] sm:$0xff]  ;;  %v528_v13 = vld [vmem:[#allocation2 + $0x1a8] sm:$0xff]  ;;  %v529_v14 = vld [vmem:[#allocation2 + $0x1b0] sm:$0xff] }
  0xb5   : > { %1895 = vmatpush3.bf16.msra.mxu0 %v1892_v18  ;;  %v530_v15 = vld [vmem:[#allocation2 + $0x1b8] sm:$0xff]  ;;  %v531_v16 = vld [vmem:[#allocation2 + $0x1c0] sm:$0xff]  ;;  %v532_v17 = vld [vmem:[#allocation2 + $0x1c8] sm:$0xff] }
  0xb6   : > { %1897 = vmatprep.subr.bf16.mxu0 %v1896_v21  ;;  %v533_v18 = vld [vmem:[#allocation2 + $0x1d0] sm:$0xff]  ;;  %v534_v19 = vld [vmem:[#allocation2 + $0x1d8] sm:$0xff]  ;;  %v535_v20 = vld [vmem:[#allocation2 + $0x1e0] sm:$0xff] }
  0xb7   : > { %v537_v22 = vld [vmem:[#allocation2 + $0x1f0] sm:$0xff]  ;;  %v538_v23 = vld [vmem:[#allocation2 + $0x1f8] sm:$0xff] }
  0xb9   : > { %1899 = vmatpush3.bf16.msra.mxu0 %v1896_v21  ;;  %v536_v21 = vld [vmem:[#allocation2 + $0x1e8] sm:$0xff] }
  0xba   : > { %1901 = vmatprep.subr.bf16.mxu0 %v1900_v24 }
  0xbd   : > { %1903 = vmatpush3.bf16.msra.mxu0 %v1900_v24  ;;  %v1088_v24 = vld [vmem:[%s2597_s20 + $0x8] sm:$0xff] }
  0xc0   : > { %1777 = vmatmul.mubr.f32.vlgmr.msra.gmra.mrb[0].mxu0 %v476_v25  ;;  %v1090_v25 = vld [vmem:[%s2597_s20 + $0x18] sm:$0xff] }
  0xc1   : > { %1779 = vmatprep.mubr.f32.mxu0 %v477_v26  ;;  %v1904_v26 = vpack.c.bf16 %v1090_v25, %v1088_v24 }
  0xc3   : > { %1905 = vmatprep.subr.bf16.mxu1 %v1904_v26 }
  0xc4   : > { %1780 = vmatmul.mubr.f32.gmra.mrb[2].mxu0 %v478_v27  ;;  %v1087_v27 = vld [vmem:[%s2597_s20] sm:$0xff] }
  0xc5   : > { %1782 = vmatprep.mubr.f32.mxu0 %v479_v28  ;;  %v1089_v28 = vld [vmem:[%s2597_s20 + $0x10] sm:$0xff] }
  0xc8   : > { %1783 = vmatmul.mubr.f32.gmra.mrb[4].mxu0 %v480_v29  ;;  %v1906_v29 = vpack.c.bf16 %v1089_v28, %v1087_v27  ;;  %v1115_v28 = vld [vmem:[%s2597_s20 + $0xe0] sm:$0xff] }
  0xc9   : > { %1785 = vmatprep.mubr.f32.mxu0 %v481_v30  ;;  %v1092_v30 = vld [vmem:[%s2597_s20 + $0x28] sm:$0xff] }
  0xca   : > { %1907 = vmatpush1.bf16.msra.mxu1 %v1906_v29  ;;  %v1117_v29 = vld [vmem:[%s2597_s20 + $0xf0] sm:$0xff] }
  0xcc   : > { %1786 = vmatmul.mubr.f32.gmra.mrb[6].mxu0 %v482_v31  ;;  %v1094_v31 = vld [vmem:[%s2597_s20 + $0x38] sm:$0xff] }
  0xcd   : > { %1788 = vmatprep.mubr.f32.mxu0 %v483_v32  ;;  %v1908_v32 = vpack.c.bf16 %v1094_v31, %v1092_v30 }
  0xcf   : > { %1909 = vmatprep.subr.bf16.mxu1 %v1908_v32 }
  0xd0   : > { %1789 = vmatmul.mubr.f32.gmra.mrb[8].mxu0 %v484_v33  ;;  %v1091_v33 = vld [vmem:[%s2597_s20 + $0x20] sm:$0xff] }
  0xd1   : > { %1791 = vmatprep.mubr.f32.mxu0 %v485_v34  ;;  %v1093_v34 = vld [vmem:[%s2597_s20 + $0x30] sm:$0xff] }
  0xd4   : > { %1792 = vmatmul.mubr.f32.gmra.mrb[10].mxu0 %v486_v35  ;;  %v1910_v35 = vpack.c.bf16 %v1093_v34, %v1091_v33 }
  0xd5   : > { %1794 = vmatprep.mubr.f32.mxu0 %v487_v36  ;;  %v1096_v36 = vld [vmem:[%s2597_s20 + $0x48] sm:$0xff] }
  0xd6   : > { %1911 = vmatpush1.bf16.msra.mxu1 %v1910_v35  ;;  %v1934_v35 = vpack.c.bf16 %v1117_v29, %v1115_v28 }
  0xd8   : > { %1795 = vmatmul.mubr.f32.gmra.mrb[12].mxu0 %v488_v37  ;;  %v1098_v37 = vld [vmem:[%s2597_s20 + $0x58] sm:$0xff] }
  0xd9   : > { %1797 = vmatprep.mubr.f32.mxu0 %v489_v38  ;;  %v1912_v38 = vpack.c.bf16 %v1098_v37, %v1096_v36 }
  0xdb   : > { %1913 = vmatprep.subr.bf16.mxu1 %v1912_v38 }
  0xdc   : > { %1798 = vmatmul.mubr.f32.gmra.mrb[14].mxu0 %v490_v39  ;;  %v1095_v39 = vld [vmem:[%s2597_s20 + $0x40] sm:$0xff] }
  0xdd   : > { %1800 = vmatprep.mubr.f32.mxu0 %v491_v40  ;;  %v1097_v40 = vld [vmem:[%s2597_s20 + $0x50] sm:$0xff] }
  0xe0   : > { %1801 = vmatmul.mubr.f32.gmra.mrb[16].mxu0 %v492_v41  ;;  %v1914_v41 = vpack.c.bf16 %v1097_v40, %v1095_v39 }
  0xe1   : > { %1803 = vmatprep.mubr.f32.mxu0 %v493_v42  ;;  %v2642_v42 = vld [vmem:[%s466_s26] ss:$0 sm:$0xff] }
  0xe2   : > { %1915 = vmatpush1.bf16.msra.mxu1 %v1914_v41 }
  0xe4   : > { %1804 = vmatmul.mubr.f32.gmra.mrb[18].mxu0 %v494_v43  ;;  %v1100_v43 = vld [vmem:[%s2597_s20 + $0x68] sm:$0xff] }
  0xe5   : > { %1806 = vmatprep.mubr.f32.mxu0 %v495_v44  ;;  %v1102_v44 = vld [vmem:[%s2597_s20 + $0x78] sm:$0xff] }
  0xe8   : > { %1807 = vmatmul.mubr.f32.gmra.mrb[20].mxu0 %v496_v45  ;;  %v1916_v45 = vpack.c.bf16 %v1102_v44, %v1100_v43 }
  0xe9   : > { %1809 = vmatprep.mubr.f32.mxu0 %v497_v46  ;;  %v1099_v46 = vld [vmem:[%s2597_s20 + $0x60] sm:$0xff] }
  0xea   : > { %1917 = vmatprep.subr.bf16.mxu1 %v1916_v45 }
  0xec   : > { %1810 = vmatmul.mubr.f32.gmra.mrb[22].mxu0 %v498_v47  ;;  %v1101_v47 = vld [vmem:[%s2597_s20 + $0x70] sm:$0xff] }
  0xed   : > { %1812 = vmatprep.mubr.f32.mxu0 %v499_v48 }
  0xf0   : > { %1813 = vmatmul.mubr.f32.gmra.mrb[24].mxu0 %v500_v49  ;;  %v1918_v49 = vpack.c.bf16 %v1101_v47, %v1099_v46 }
  0xf1   : > { %1815 = vmatprep.mubr.f32.mxu0 %v501_v50 }
  0xf2   : > { %1919 = vmatpush1.bf16.msra.mxu1 %v1918_v49 }
  0xf4   : > { %1816 = vmatmul.mubr.f32.gmra.mrb[26].mxu0 %v502_v51 }
  0xf5   : > { %1818 = vmatprep.mubr.f32.mxu0 %v503_v52 }
  0xf8   : > { %1819 = vmatmul.mubr.f32.gmra.mrb[28].mxu0 %v504_v53  ;;  %v1104_v53 = vld [vmem:[%s2597_s20 + $0x88] sm:$0xff] }
  0xf9   : > { %1821 = vmatprep.mubr.f32.mxu0 %v505_v54  ;;  %v1106_v54 = vld [vmem:[%s2597_s20 + $0x98] sm:$0xff] }
  0xfc   : > { %1822 = vmatmul.mubr.f32.gmra.mrb[30].mxu0 %v506_v55 }
  0xfd   : > { %1824 = vmatprep.mubr.f32.mxu0 %v507_v56  ;;  %v1920_v56 = vpack.c.bf16 %v1106_v54, %v1104_v53 }
  0xff   : > { %1921 = vmatprep.subr.bf16.mxu1 %v1920_v56 }
 0x100   : > { %1825 = vmatmul.mubr.f32.gmra.mrb[32].mxu0 %v508_v57  ;;  %v1103_v57 = vld [vmem:[%s2597_s20 + $0x80] sm:$0xff] }
 0x101   : > { %1827 = vmatprep.mubr.f32.mxu0 %v509_v58  ;;  %v1105_v58 = vld [vmem:[%s2597_s20 + $0x90] sm:$0xff] }
 0x104   : > { %1828 = vmatmul.mubr.f32.gmra.mrb[34].mxu0 %v510_v59 }
 0x105   : > { %1830 = vmatprep.mubr.f32.mxu0 %v511_v60 }
 0x108   : > { %1831 = vmatmul.mubr.f32.gmra.mrb[36].mxu0 %v512_v61  ;;  %v1922_v61 = vpack.c.bf16 %v1105_v58, %v1103_v57 }
 0x109   : > { %1833 = vmatprep.mubr.f32.mxu0 %v513_v62 }
 0x10a   : > { %1923 = vmatpush1.bf16.msra.mxu1 %v1922_v61 }
 0x10c   : > { %1834 = vmatmul.mubr.f32.gmra.mrb[38].mxu0 %v514_v63 }
 0x10d   : > { %1836 = vmatprep.mubr.f32.mxu0 %v515_v0 }
 0x110   : > { %1837 = vmatmul.mubr.f32.gmra.mrb[40].mxu0 %v516_v1 }
 0x111   : > { %1839 = vmatprep.mubr.f32.mxu0 %v517_v2  ;;  %v1108_v2 = vld [vmem:[%s2597_s20 + $0xa8] sm:$0xff] }
 0x114   : > { %1840 = vmatmul.mubr.f32.gmra.mrb[42].mxu0 %v518_v3  ;;  %v1110_v3 = vld [vmem:[%s2597_s20 + $0xb8] sm:$0xff] }
 0x115   : > { %1842 = vmatprep.mubr.f32.mxu0 %v519_v4  ;;  %v1924_v4 = vpack.c.bf16 %v1110_v3, %v1108_v2 }
 0x117   : > { %1925 = vmatprep.subr.bf16.mxu1 %v1924_v4 }
 0x118   : > { %1843 = vmatmul.mubr.f32.gmra.mrb[44].mxu0 %v520_v5  ;;  %v1107_v5 = vld [vmem:[%s2597_s20 + $0xa0] sm:$0xff] }
 0x119   : > { %1845 = vmatprep.mubr.f32.mxu0 %v521_v6  ;;  %v1109_v6 = vld [vmem:[%s2597_s20 + $0xb0] sm:$0xff] }
 0x11c   : > { %1846 = vmatmul.mubr.f32.gmra.mrb[46].mxu0 %v522_v7 }
 0x11d   : > { %1848 = vmatprep.mubr.f32.mxu0 %v523_v8 }
 0x120   : > { %1849 = vmatmul.mubr.f32.gmra.mrb[48].mxu0 %v524_v9  ;;  %v1926_v9 = vpack.c.bf16 %v1109_v6, %v1107_v5 }
 0x121   : > { %1851 = vmatprep.mubr.f32.mxu0 %v525_v10 }
 0x122   : > { %1927 = vmatpush1.bf16.msra.mxu1 %v1926_v9 }
 0x124   : > { %1852 = vmatmul.mubr.f32.gmra.mrb[50].mxu0 %v526_v11 }
 0x125   : > { %1854 = vmatprep.mubr.f32.mxu0 %v527_v12 }
 0x128   : > { %1855 = vmatmul.mubr.f32.gmra.mrb[52].mxu0 %v528_v13 }
 0x129   : > { %1857 = vmatprep.mubr.f32.mxu0 %v529_v14 }
 0x12c   : > { %1858 = vmatmul.mubr.f32.gmra.mrb[54].mxu0 %v530_v15  ;;  %v1112_v15 = vld [vmem:[%s2597_s20 + $0xc8] sm:$0xff] }
 0x12d   : > { %1860 = vmatprep.mubr.f32.mxu0 %v531_v16  ;;  %v1114_v16 = vld [vmem:[%s2597_s20 + $0xd8] sm:$0xff] }
 0x130   : > { %1861 = vmatmul.mubr.f32.gmra.mrb[56].mxu0 %v532_v17  ;;  %v1111_v17 = vld [vmem:[%s2597_s20 + $0xc0] sm:$0xff] }
 0x131   : > { %1863 = vmatprep.mubr.f32.mxu0 %v533_v18  ;;  %v1928_v18 = vpack.c.bf16 %v1114_v16, %v1112_v15 }
 0x133   : > { %1929 = vmatprep.subr.bf16.mxu1 %v1928_v18 }
 0x134   : > { %1864 = vmatmul.mubr.f32.gmra.mrb[58].mxu0 %v534_v19  ;;  %v1113_v19 = vld [vmem:[%s2597_s20 + $0xd0] sm:$0xff] }
 0x135   : > { %1866 = vmatprep.mubr.f32.mxu0 %v535_v20  ;;  %v1116_v20 = vld [vmem:[%s2597_s20 + $0xe8] sm:$0xff]  ;;  %v1930_v26 = vpack.c.bf16 %v1113_v19, %v1111_v17 }
 0x137   : > { %1931 = vmatpush1.bf16.msra.mxu1 %v1930_v26 }
 0x138   : > { %1867 = vmatmul.mubr.f32.gmra.mrb[60].mxu0 %v536_v21  ;;  %v1118_v21 = vld [vmem:[%s2597_s20 + $0xf8] sm:$0xff]  ;;  %s2199_s20 = scalar_lea.vmem %s1440_s14, 32 }
 0x139   : > { %1869 = vmatprep.mubr.f32.mxu0 %v537_v22  ;;  %v2315_v22 = vmov 0.0   ;;  %v1932_v27 = vpack.c.bf16 %v1118_v21, %v1116_v20  ;;  %p2200_p9 = scmp.ne.s32.totalorder %s1440_s14, %s2199_s20 }
 0x13a   : > { %1200 = vmatprep.mubr.f32.mxu1 %v2315_v22 }
 0x13b   : > { %1933 = vmatprep.subr.bf16.mxu1 %v1932_v27  ;;  %p2201_p4 = pnand %p2200_p9, %p2939_p12 }
 0x13c   : > { %1870 = vmatmul.mubr.f32.gmra.mrb[62].mxu0 %v538_v23  ;;  %1935 = vmatpush1.bf16.msra.mxu1 %v1934_v35 }
 0x13d   : > { %p2202_p1 = pneg %p2201_p4 }
 0x193   : > { %v1778_v48 = vpop.f32.mrb[0].mxu0 }
 0x194   : > { %v634_v50 = vadd.f32 %v1778_v48, %v2642_v42  ;;  %v628_v51 = vpop.f32.mrb[1].mxu0 }
 0x195   : > { %v629_v52 = vadd.f32 %v2642_v42, %v628_v51  ;;  %v1213_v51 = vld [vmem:[%s2600_s18 + $0x18] sm:$0xff] }
 0x196   : > { %v948_v55 = vmax.f32 %v634_v50, 0.0  ;;  %v1211_v50 = vld [vmem:[%s2600_s18 + $0x8] sm:$0xff] }
 0x197   : > { %v947_v59 = vmax.f32 %v629_v52, 0.0  ;;  %v1781_v60 = vpop.f32.mrb[2].mxu0 }
 0x198   : > { %v638_v62 = vpop.f32.mrb[3].mxu0  ;;  %v644_v0 = vadd.f32 %v1781_v60, %v2642_v42 }
 0x199   : > { %v1011_v63 = vadd.f32 %v948_v55, %v947_v59  ;;  %v639_v1 = vadd.f32 %v2642_v42, %v638_v62  ;;  %v1936_v55 = vpack.c.bf16 %v1213_v51, %v1211_v50 }
 0x19a   : > { %v950_v12 = vmax.f32 %v644_v0, 0.0 }
 0x19b   : > { %v949_v7 = vmax.f32 %v639_v1, 0.0  ;;  %v1784_v8 = vpop.f32.mrb[4].mxu0  ;;  %1937 = vmatprep.subr.bf16.mxu1 %v1936_v55 }
 0x19c   : > { %v654_v10 = vadd.f32 %v1784_v8, %v2642_v42  ;;  %v648_v11 = vpop.f32.mrb[5].mxu0 }
 0x19d   : > { %v1012_v13 = vadd.f32 %v1011_v63, %v949_v7  ;;  %v649_v14 = vadd.f32 %v2642_v42, %v648_v11 }
 0x19e   : > { %v952_v30 = vmax.f32 %v654_v10, 0.0 }
 0x19f   : > { %v951_v23 = vmax.f32 %v649_v14, 0.0  ;;  %v1013_v24 = vadd.f32 %v1012_v13, %v950_v12  ;;  %v1787_v25 = vpop.f32.mrb[6].mxu0 }
 0x1a0   : > { %v658_v31 = vpop.f32.mrb[7].mxu0  ;;  %v664_v33 = vadd.f32 %v1787_v25, %v2642_v42 }
 0x1a1   : > { %v1014_v32 = vadd.f32 %v1013_v24, %v951_v23  ;;  %v659_v34 = vadd.f32 %v2642_v42, %v658_v31 }
 0x1a2   : > { %v954_v41 = vmax.f32 %v664_v33, 0.0 }
 0x1a3   : > { %v953_v36 = vmax.f32 %v659_v34, 0.0  ;;  %v1015_v37 = vadd.f32 %v1014_v32, %v952_v30  ;;  %v1790_v38 = vpop.f32.mrb[8].mxu0 }
 0x1a4   : > { %v674_v39 = vadd.f32 %v1790_v38, %v2642_v42  ;;  %v668_v40 = vpop.f32.mrb[9].mxu0 }
 0x1a5   : > { %v1016_v43 = vadd.f32 %v1015_v37, %v953_v36  ;;  %v669_v44 = vadd.f32 %v2642_v42, %v668_v40 }
 0x1a6   : > { %v956_v48 = vmax.f32 %v674_v39, 0.0 }
 0x1a7   : > { %v955_v45 = vmax.f32 %v669_v44, 0.0  ;;  %v1017_v46 = vadd.f32 %v1016_v43, %v954_v41  ;;  %v1793_v47 = vpop.f32.mrb[10].mxu0 }
 0x1a8   : > { %v678_v49 = vpop.f32.mrb[11].mxu0  ;;  %v684_v53 = vadd.f32 %v1793_v47, %v2642_v42 }
 0x1a9   : > { %v1018_v52 = vadd.f32 %v1017_v46, %v955_v45  ;;  %v679_v54 = vadd.f32 %v2642_v42, %v678_v49 }
 0x1aa   : > { %v958_v60 = vmax.f32 %v684_v53, 0.0 }
 0x1ab   : > { %v957_v56 = vmax.f32 %v679_v54, 0.0  ;;  %v1019_v57 = vadd.f32 %v1018_v52, %v956_v48  ;;  %v1796_v58 = vpop.f32.mrb[12].mxu0 }
 0x1ac   : > { %v688_v59 = vpop.f32.mrb[13].mxu0  ;;  %v694_v62 = vadd.f32 %v1796_v58, %v2642_v42 }
 0x1ad   : > { %v1020_v61 = vadd.f32 %v1019_v57, %v957_v56  ;;  %v689_v63 = vadd.f32 %v2642_v42, %v688_v59 }
 0x1ae   : > { %v960_v4 = vmax.f32 %v694_v62, 0.0 }
 0x1af   : > { %v959_v0 = vmax.f32 %v689_v63, 0.0  ;;  %v1021_v1 = vadd.f32 %v1020_v61, %v958_v60  ;;  %v1799_v2 = vpop.f32.mrb[14].mxu0 }
 0x1b0   : > { %v698_v3 = vpop.f32.mrb[15].mxu0  ;;  %v704_v6 = vadd.f32 %v1799_v2, %v2642_v42 }
 0x1b1   : > { %v1022_v5 = vadd.f32 %v1021_v1, %v959_v0  ;;  %v699_v7 = vadd.f32 %v2642_v42, %v698_v3 }
 0x1b2   : > { %v962_v12 = vmax.f32 %v704_v6, 0.0 }
 0x1b3   : > { %v961_v8 = vmax.f32 %v699_v7, 0.0  ;;  %v1023_v9 = vadd.f32 %v1022_v5, %v960_v4  ;;  %v1802_v10 = vpop.f32.mrb[16].mxu0 }
 0x1b4   : > { %v708_v11 = vpop.f32.mrb[17].mxu0  ;;  %v714_v14 = vadd.f32 %v1802_v10, %v2642_v42 }
 0x1b5   : > { %v1024_v13 = vadd.f32 %v1023_v9, %v961_v8  ;;  %v709_v15 = vadd.f32 %v2642_v42, %v708_v11 }
 0x1b6   : > { %v964_v20 = vmax.f32 %v714_v14, 0.0 }
 0x1b7   : > { %v963_v16 = vmax.f32 %v709_v15, 0.0  ;;  %v1025_v17 = vadd.f32 %v1024_v13, %v962_v12  ;;  %v1805_v18 = vpop.f32.mrb[18].mxu0 }
 0x1b8   : > { %v718_v19 = vpop.f32.mrb[19].mxu0  ;;  %v724_v22 = vadd.f32 %v1805_v18, %v2642_v42 }
 0x1b9   : > { %v1026_v21 = vadd.f32 %v1025_v17, %v963_v16  ;;  %v719_v23 = vadd.f32 %v2642_v42, %v718_v19 }
 0x1ba   : > { %v966_v28 = vmax.f32 %v724_v22, 0.0 }
 0x1bb   : > { %v965_v24 = vmax.f32 %v719_v23, 0.0  ;;  %v1027_v25 = vadd.f32 %v1026_v21, %v964_v20  ;;  %v1808_v26 = vpop.f32.mrb[20].mxu0 }
 0x1bc   : > { %v728_v27 = vpop.f32.mrb[21].mxu0  ;;  %v734_v30 = vadd.f32 %v1808_v26, %v2642_v42 }
 0x1bd   : > { %v1028_v29 = vadd.f32 %v1027_v25, %v965_v24  ;;  %v729_v31 = vadd.f32 %v2642_v42, %v728_v27 }
 0x1be   : > { %v968_v36 = vmax.f32 %v734_v30, 0.0 }
 0x1bf   : > { %v967_v32 = vmax.f32 %v729_v31, 0.0  ;;  %v1029_v33 = vadd.f32 %v1028_v29, %v966_v28  ;;  %v1811_v34 = vpop.f32.mrb[22].mxu0 }
 0x1c0   : > { %v738_v35 = vpop.f32.mrb[23].mxu0  ;;  %v744_v38 = vadd.f32 %v1811_v34, %v2642_v42 }
 0x1c1   : > { %v1030_v37 = vadd.f32 %v1029_v33, %v967_v32  ;;  %v739_v39 = vadd.f32 %v2642_v42, %v738_v35 }
 0x1c2   : > { %v970_v45 = vmax.f32 %v744_v38, 0.0 }
 0x1c3   : > { %v969_v40 = vmax.f32 %v739_v39, 0.0  ;;  %v1031_v41 = vadd.f32 %v1030_v37, %v968_v36  ;;  %v1814_v43 = vpop.f32.mrb[24].mxu0 }
 0x1c4   : > { %v748_v44 = vpop.f32.mrb[25].mxu0  ;;  %v754_v47 = vadd.f32 %v1814_v43, %v2642_v42 }
 0x1c5   : > { %v1032_v46 = vadd.f32 %v1031_v41, %v969_v40  ;;  %v749_v48 = vadd.f32 %v2642_v42, %v748_v44 }
 0x1c6   : > { %v972_v53 = vmax.f32 %v754_v47, 0.0 }
 0x1c7   : > { %v971_v49 = vmax.f32 %v749_v48, 0.0  ;;  %v1033_v50 = vadd.f32 %v1032_v46, %v970_v45  ;;  %v1817_v51 = vpop.f32.mrb[26].mxu0 }
 0x1c8   : > { %v758_v52 = vpop.f32.mrb[27].mxu0  ;;  %v764_v55 = vadd.f32 %v1817_v51, %v2642_v42 }
 0x1c9   : > { %v1034_v54 = vadd.f32 %v1033_v50, %v971_v49  ;;  %v759_v56 = vadd.f32 %v2642_v42, %v758_v52 }
 0x1ca   : > { %v974_v61 = vmax.f32 %v764_v55, 0.0 }
 0x1cb   : > { %v973_v57 = vmax.f32 %v759_v56, 0.0  ;;  %v1035_v58 = vadd.f32 %v1034_v54, %v972_v53  ;;  %v1820_v59 = vpop.f32.mrb[28].mxu0 }
 0x1cc   : > { %v768_v60 = vpop.f32.mrb[29].mxu0  ;;  %v774_v63 = vadd.f32 %v1820_v59, %v2642_v42 }
 0x1cd   : > { %v1036_v62 = vadd.f32 %v1035_v58, %v973_v57  ;;  %v769_v0 = vadd.f32 %v2642_v42, %v768_v60 }
 0x1ce   : > { %v976_v5 = vmax.f32 %v774_v63, 0.0 }
 0x1cf   : > { %v975_v1 = vmax.f32 %v769_v0, 0.0  ;;  %v1037_v2 = vadd.f32 %v1036_v62, %v974_v61  ;;  %v1823_v3 = vpop.f32.mrb[30].mxu0 }
 0x1d0   : > { %v778_v4 = vpop.f32.mrb[31].mxu0  ;;  %v784_v7 = vadd.f32 %v1823_v3, %v2642_v42 }
 0x1d1   : > { %v1038_v6 = vadd.f32 %v1037_v2, %v975_v1  ;;  %v779_v8 = vadd.f32 %v2642_v42, %v778_v4 }
 0x1d2   : > { %v978_v14 = vmax.f32 %v784_v7, 0.0 }
 0x1d3   : > { %v977_v9 = vmax.f32 %v779_v8, 0.0  ;;  %v1039_v10 = vadd.f32 %v1038_v6, %v976_v5  ;;  %v1826_v11 = vpop.f32.mrb[32].mxu0 }
 0x1d4   : > { %v794_v12 = vadd.f32 %v1826_v11, %v2642_v42  ;;  %v788_v13 = vpop.f32.mrb[33].mxu0 }
 0x1d5   : > { %v1040_v15 = vadd.f32 %v1039_v10, %v977_v9  ;;  %v789_v16 = vadd.f32 %v2642_v42, %v788_v13 }
 0x1d6   : > { %v980_v17 = vmax.f32 %v794_v12, 0.0 }
 0x1d7   : > { %v2700_v18 = vadd.f32 %v1040_v15, %v978_v14  ;;  %v979_v19 = vmax.f32 %v789_v16, 0.0  ;;  %v1829_v20 = vpop.f32.mrb[34].mxu0 }
 0x1d8   : > { %v798_v21 = vpop.f32.mrb[35].mxu0  ;;  %v804_v23 = vadd.f32 %v1829_v20, %v2642_v42 }
 0x1d9   : > { %v1048_v22 = vadd.f32 %v980_v17, %v979_v19  ;;  %v799_v24 = vadd.f32 %v2642_v42, %v798_v21 }
 0x1da   : > { %v982_v28 = vmax.f32 %v804_v23, 0.0 }
 0x1db   : > { %v981_v25 = vmax.f32 %v799_v24, 0.0  ;;  %v1832_v26 = vpop.f32.mrb[36].mxu0 }
 0x1dc   : > { %v808_v27 = vpop.f32.mrb[37].mxu0  ;;  %v814_v30 = vadd.f32 %v1832_v26, %v2642_v42 }
 0x1dd   : > { %v1049_v29 = vadd.f32 %v1048_v22, %v981_v25  ;;  %v809_v31 = vadd.f32 %v2642_v42, %v808_v27 }
 0x1de   : > { %v984_v36 = vmax.f32 %v814_v30, 0.0 }
 0x1df   : > { %v983_v32 = vmax.f32 %v809_v31, 0.0  ;;  %v1050_v33 = vadd.f32 %v1049_v29, %v982_v28  ;;  %v1835_v34 = vpop.f32.mrb[38].mxu0 }
 0x1e0   : > { %v818_v35 = vpop.f32.mrb[39].mxu0  ;;  %v824_v38 = vadd.f32 %v1835_v34, %v2642_v42 }
 0x1e1   : > { %v1051_v37 = vadd.f32 %v1050_v33, %v983_v32  ;;  %v819_v39 = vadd.f32 %v2642_v42, %v818_v35 }
 0x1e2   : > { %v986_v45 = vmax.f32 %v824_v38, 0.0 }
 0x1e3   : > { %v985_v40 = vmax.f32 %v819_v39, 0.0  ;;  %v1052_v41 = vadd.f32 %v1051_v37, %v984_v36  ;;  %v1838_v43 = vpop.f32.mrb[40].mxu0 }
 0x1e4   : > { %v828_v44 = vpop.f32.mrb[41].mxu0  ;;  %v834_v47 = vadd.f32 %v1838_v43, %v2642_v42 }
 0x1e5   : > { %v1053_v46 = vadd.f32 %v1052_v41, %v985_v40  ;;  %v829_v48 = vadd.f32 %v2642_v42, %v828_v44 }
 0x1e6   : > { %v988_v53 = vmax.f32 %v834_v47, 0.0 }
 0x1e7   : > { %v987_v49 = vmax.f32 %v829_v48, 0.0  ;;  %v1054_v50 = vadd.f32 %v1053_v46, %v986_v45  ;;  %v1841_v51 = vpop.f32.mrb[42].mxu0 }
 0x1e8   : > { %v838_v52 = vpop.f32.mrb[43].mxu0  ;;  %v844_v55 = vadd.f32 %v1841_v51, %v2642_v42 }
 0x1e9   : > { %v1055_v54 = vadd.f32 %v1054_v50, %v987_v49  ;;  %v839_v56 = vadd.f32 %v2642_v42, %v838_v52 }
 0x1ea   : > { %v990_v61 = vmax.f32 %v844_v55, 0.0 }
 0x1eb   : > { %v989_v57 = vmax.f32 %v839_v56, 0.0  ;;  %v1056_v58 = vadd.f32 %v1055_v54, %v988_v53  ;;  %v1844_v59 = vpop.f32.mrb[44].mxu0 }
 0x1ec   : > { %v848_v60 = vpop.f32.mrb[45].mxu0  ;;  %v854_v63 = vadd.f32 %v1844_v59, %v2642_v42 }
 0x1ed   : > { %v1057_v62 = vadd.f32 %v1056_v58, %v989_v57  ;;  %v849_v0 = vadd.f32 %v2642_v42, %v848_v60 }
 0x1ee   : > { %v992_v5 = vmax.f32 %v854_v63, 0.0 }
 0x1ef   : > { %v991_v1 = vmax.f32 %v849_v0, 0.0  ;;  %v1058_v2 = vadd.f32 %v1057_v62, %v990_v61  ;;  %v1847_v3 = vpop.f32.mrb[46].mxu0  ;;  %v1042_v62 = vrot.slane %v2700_v18, 4 }
 0x1f0   : > { %v858_v4 = vpop.f32.mrb[47].mxu0  ;;  %v864_v7 = vadd.f32 %v1847_v3, %v2642_v42 }
 0x1f1   : > { %v1059_v6 = vadd.f32 %v1058_v2, %v991_v1  ;;  %v859_v8 = vadd.f32 %v2642_v42, %v858_v4 }
 0x1f2   : > { %v994_v13 = vmax.f32 %v864_v7, 0.0  ;;  %v1043_v7 = vadd.f32 %v1042_v62, %v2700_v18  ;;  %v1232_v62 = vld [vmem:[%s2600_s18 + $0xb0] sm:$0xff] }
 0x1f3   : > { %v993_v9 = vmax.f32 %v859_v8, 0.0  ;;  %v1060_v10 = vadd.f32 %v1059_v6, %v992_v5  ;;  %v1850_v11 = vpop.f32.mrb[48].mxu0 }
 0x1f4   : > { %v868_v12 = vpop.f32.mrb[49].mxu0  ;;  %v874_v15 = vadd.f32 %v1850_v11, %v2642_v42 }
 0x1f5   : > { %v1061_v14 = vadd.f32 %v1060_v10, %v993_v9  ;;  %v869_v16 = vadd.f32 %v2642_v42, %v868_v12 }
 0x1f6   : > { %v996_v22 = vmax.f32 %v874_v15, 0.0  ;;  %v1044_v15 = vrot.slane %v1043_v7, 2 }
 0x1f7   : > { %v995_v17 = vmax.f32 %v869_v16, 0.0  ;;  %v1062_v19 = vadd.f32 %v1061_v14, %v994_v13  ;;  %v1853_v20 = vpop.f32.mrb[50].mxu0 }
 0x1f8   : > { %v878_v21 = vpop.f32.mrb[51].mxu0  ;;  %v884_v24 = vadd.f32 %v1853_v20, %v2642_v42 }
 0x1f9   : > { %v1063_v23 = vadd.f32 %v1062_v19, %v995_v17  ;;  %v879_v25 = vadd.f32 %v2642_v42, %v878_v21  ;;  %v1045_v21 = vadd.f32 %v1044_v15, %v1043_v7  ;;  %v1242_v15 = vld [vmem:[%s2600_s18 + $0x100] sm:$0xff] }
 0x1fa   : > { %v998_v30 = vmax.f32 %v884_v24, 0.0 }
 0x1fb   : > { %v997_v26 = vmax.f32 %v879_v25, 0.0  ;;  %v1064_v27 = vadd.f32 %v1063_v23, %v996_v22  ;;  %v1856_v28 = vpop.f32.mrb[52].mxu0  ;;  %v1046_v23 = vrot.slane %v1045_v21, 1 }
 0x1fc   : > { %v888_v29 = vpop.f32.mrb[53].mxu0  ;;  %v894_v32 = vadd.f32 %v1856_v28, %v2642_v42 }
 0x1fd   : > { %v1065_v31 = vadd.f32 %v1064_v27, %v997_v26  ;;  %v889_v33 = vadd.f32 %v2642_v42, %v888_v29  ;;  %v1047_v25 = vadd.f32 %v1046_v23, %v1045_v21  ;;  %v1210_v26 = vld [vmem:[%s2600_s18] sm:$0xff]  ;;  %v1212_v27 = vld [vmem:[%s2600_s18 + $0x10] sm:$0xff]  ;;  %v1215_v29 = vld [vmem:[%s2600_s18 + $0x28] sm:$0xff] }
 0x1fe   : > { %v1000_v38 = vmax.f32 %v894_v32, 0.0  ;;  %v1251_v23 = vld [vmem:[%s2600_s18 + $0x148] sm:$0xff] }
 0x1ff   : > { %v999_v34 = vmax.f32 %v889_v33, 0.0  ;;  %v1066_v35 = vadd.f32 %v1065_v31, %v998_v30  ;;  %v1859_v36 = vpop.f32.mrb[54].mxu0  ;;  %v1217_v30 = vld [vmem:[%s2600_s18 + $0x38] sm:$0xff]  ;;  %v1085_v31 = vmul.f32 0.00390625, %v1047_v25  ;;  %v1938_v33 = vpack.c.bf16 %v1212_v27, %v1210_v26  ;;  %v1250_v26 = vld [vmem:[%s2600_s18 + $0x140] sm:$0xff]  ;;  %v1252_v27 = vld [vmem:[%s2600_s18 + $0x150] sm:$0xff] }
 0x200   : > { %v898_v37 = vpop.f32.mrb[55].mxu0  ;;  %v904_v40 = vadd.f32 %v1859_v36, %v2642_v42  ;;  %v1216_v36 = vld [vmem:[%s2600_s18 + $0x30] sm:$0xff] }
 0x201   : > { %v1067_v39 = vadd.f32 %v1066_v35, %v999_v34  ;;  %v899_v41 = vadd.f32 %v2642_v42, %v898_v37  ;;  %v1940_v34 = vpack.c.bf16 %v1217_v30, %v1215_v29  ;;  %v1214_v35 = vld [vmem:[%s2600_s18 + $0x20] sm:$0xff]  ;;  %v1257_v29 = vld [vmem:[%s2600_s18 + $0x178] sm:$0xff]  ;;  %v1978_v30 = vpack.c.bf16 %v1252_v27, %v1250_v26 }
 0x202   : > { %v1002_v47 = vmax.f32 %v904_v40, 0.0  ;;  %v1942_v40 = vpack.c.bf16 %v1216_v36, %v1214_v35  ;;  %v1261_v35 = vld [vmem:[%s2600_s18 + $0x198] sm:$0xff] }
 0x203   : > { %v1001_v43 = vmax.f32 %v899_v41, 0.0  ;;  %v1068_v44 = vadd.f32 %v1067_v39, %v1000_v38  ;;  %v1862_v45 = vpop.f32.mrb[56].mxu0  ;;  %v1219_v38 = vld [vmem:[%s2600_s18 + $0x48] sm:$0xff]  ;;  %v1221_v39 = vld [vmem:[%s2600_s18 + $0x58] sm:$0xff] }
 0x204   : > { %v908_v46 = vpop.f32.mrb[57].mxu0  ;;  %v914_v49 = vadd.f32 %v1862_v45, %v2642_v42  ;;  %v1944_v41 = vpack.c.bf16 %v1221_v39, %v1219_v38  ;;  %v1223_v45 = vld [vmem:[%s2600_s18 + $0x68] sm:$0xff]  ;;  %v1258_v38 = vld [vmem:[%s2600_s18 + $0x180] sm:$0xff]  ;;  %v1260_v39 = vld [vmem:[%s2600_s18 + $0x190] sm:$0xff] }
 0x205   : > { %v1069_v48 = vadd.f32 %v1068_v44, %v1001_v43  ;;  %v909_v50 = vadd.f32 %v2642_v42, %v908_v46  ;;  %v1218_v43 = vld [vmem:[%s2600_s18 + $0x40] sm:$0xff]  ;;  %v1220_v44 = vld [vmem:[%s2600_s18 + $0x50] sm:$0xff]  ;;  %v1225_v46 = vld [vmem:[%s2600_s18 + $0x78] sm:$0xff] }
 0x206   : > { %v1004_v55 = vmax.f32 %v914_v49, 0.0  ;;  %v1222_v49 = vld [vmem:[%s2600_s18 + $0x60] sm:$0xff] }
 0x207   : > { %v1003_v51 = vmax.f32 %v909_v50, 0.0  ;;  %v1070_v52 = vadd.f32 %v1069_v48, %v1002_v47  ;;  %v1865_v53 = vpop.f32.mrb[58].mxu0  ;;  %v1946_v47 = vpack.c.bf16 %v1220_v44, %v1218_v43  ;;  %v1948_v48 = vpack.c.bf16 %v1225_v46, %v1223_v45  ;;  %v1224_v50 = vld [vmem:[%s2600_s18 + $0x70] sm:$0xff]  ;;  %v1262_v45 = vld [vmem:[%s2600_s18 + $0x1a0] sm:$0xff] }
 0x208   : > { %v918_v54 = vpop.f32.mrb[59].mxu0  ;;  %v924_v57 = vadd.f32 %v1865_v53, %v2642_v42  ;;  %v1950_v53 = vpack.c.bf16 %v1224_v50, %v1222_v49  ;;  %v1986_v43 = vpack.c.bf16 %v1260_v39, %v1258_v38  ;;  %v1264_v46 = vld [vmem:[%s2600_s18 + $0x1b0] sm:$0xff] }
 0x209   : > { %v1071_v56 = vadd.f32 %v1070_v52, %v1003_v51  ;;  %v919_v58 = vadd.f32 %v2642_v42, %v918_v54  ;;  %v1227_v51 = vld [vmem:[%s2600_s18 + $0x88] sm:$0xff]  ;;  %v1229_v52 = vld [vmem:[%s2600_s18 + $0x98] sm:$0xff]  ;;  %v1990_v49 = vpack.c.bf16 %v1264_v46, %v1262_v45 }
 0x20a   : > { %v1006_v0 = vmax.f32 %v924_v57, 0.0  ;;  %v1952_v54 = vpack.c.bf16 %v1229_v52, %v1227_v51  ;;  %v1231_v57 = vld [vmem:[%s2600_s18 + $0xa8] sm:$0xff]  ;;  %v1266_v51 = vld [vmem:[%s2600_s18 + $0x1c0] sm:$0xff]  ;;  %v1268_v52 = vld [vmem:[%s2600_s18 + $0x1d0] sm:$0xff] }
 0x20b   : > { %v1005_v59 = vmax.f32 %v919_v58, 0.0  ;;  %v1072_v60 = vadd.f32 %v1071_v56, %v1004_v55  ;;  %v1868_v61 = vpop.f32.mrb[60].mxu0  ;;  %v1226_v55 = vld [vmem:[%s2600_s18 + $0x80] sm:$0xff]  ;;  %v1228_v56 = vld [vmem:[%s2600_s18 + $0x90] sm:$0xff]  ;;  %v1233_v58 = vld [vmem:[%s2600_s18 + $0xb8] sm:$0xff] }
 0x20c   : > { %v928_v63 = vpop.f32.mrb[61].mxu0  ;;  %v934_v2 = vadd.f32 %v1868_v61, %v2642_v42  ;;  %v1230_v61 = vld [vmem:[%s2600_s18 + $0xa0] sm:$0xff] }
 0x20d   : > { %v1073_v1 = vadd.f32 %v1072_v60, %v1005_v59  ;;  %v929_v3 = vadd.f32 %v2642_v42, %v928_v63  ;;  %v1954_v59 = vpack.c.bf16 %v1228_v56, %v1226_v55  ;;  %v1956_v60 = vpack.c.bf16 %v1233_v58, %v1231_v57  ;;  %v1235_v63 = vld [vmem:[%s2600_s18 + $0xc8] sm:$0xff]  ;;  %v1273_v55 = vld [vmem:[%s2600_s18 + $0x1f8] sm:$0xff]  ;;  %v1270_v57 = vld [vmem:[%s2600_s18 + $0x1e0] sm:$0xff] }
 0x20e   : > { %v1008_v9 = vmax.f32 %v934_v2, 0.0  ;;  %v1272_v58 = vld [vmem:[%s2600_s18 + $0x1f0] sm:$0xff] }
 0x20f   : > { %v1007_v4 = vmax.f32 %v929_v3, 0.0  ;;  %v1074_v5 = vadd.f32 %v1073_v1, %v1006_v0  ;;  %v1871_v6 = vpop.f32.mrb[62].mxu0  ;;  %v1237_v0 = vld [vmem:[%s2600_s18 + $0xd8] sm:$0xff]  ;;  %v1958_v1 = vpack.c.bf16 %v1232_v62, %v1230_v61  ;;  %v1234_v3 = vld [vmem:[%s2600_s18 + $0xc0] sm:$0xff] }
 0x210   : > { %v938_v8 = vpop.f32.mrb[63].mxu0  ;;  %v944_v11 = vadd.f32 %v1871_v6, %v2642_v42  ;;  %v1960_v2 = vpack.c.bf16 %v1237_v0, %v1235_v63  ;;  %v1241_v6 = vld [vmem:[%s2600_s18 + $0xf8] sm:$0xff]  ;;  %v1119_v63 = vld [vmem:[%s470_s17] sm:$0x3] }
 0x211   : > { %v1075_v10 = vadd.f32 %v1074_v5, %v1007_v4  ;;  %v939_v12 = vadd.f32 %v2642_v42, %v938_v8  ;;  %v1236_v4 = vld [vmem:[%s2600_s18 + $0xd0] sm:$0xff]  ;;  %v1239_v5 = vld [vmem:[%s2600_s18 + $0xe8] sm:$0xff] }
 0x212   : > { %v1010_v16 = vmax.f32 %v944_v11, 0.0  ;;  %v1962_v7 = vpack.c.bf16 %v1236_v4, %v1234_v3  ;;  %v1964_v8 = vpack.c.bf16 %v1241_v6, %v1239_v5  ;;  %v1243_v11 = vld [vmem:[%s2600_s18 + $0x108] sm:$0xff] }
 0x213   : > { %v1009_v13 = vmax.f32 %v939_v12, 0.0  ;;  %v1076_v14 = vadd.f32 %v1075_v10, %v1008_v9  ;;  %v1238_v9 = vld [vmem:[%s2600_s18 + $0xe0] sm:$0xff]  ;;  %v1240_v10 = vld [vmem:[%s2600_s18 + $0xf0] sm:$0xff]  ;;  %v1245_v12 = vld [vmem:[%s2600_s18 + $0x118] sm:$0xff] }
 0x215   : > { %v1077_v17 = vadd.f32 %v1076_v14, %v1009_v13  ;;  %v1966_v13 = vpack.c.bf16 %v1240_v10, %v1238_v9  ;;  %v1968_v14 = vpack.c.bf16 %v1245_v12, %v1243_v11 }
 0x217   : > { %v1078_v19 = vadd.f32 %v1077_v17, %v1010_v16  ;;  %v1244_v16 = vld [vmem:[%s2600_s18 + $0x110] sm:$0xff]  ;;  %v1247_v17 = vld [vmem:[%s2600_s18 + $0x128] sm:$0xff] }
 0x219   : > { %v1079_v20 = vrot.slane %v1078_v19, 4 }
 0x21b   : > { %v1080_v18 = vadd.f32 %v1079_v20, %v1078_v19  ;;  %v1249_v19 = vld [vmem:[%s2600_s18 + $0x138] sm:$0xff]  ;;  %v1970_v20 = vpack.c.bf16 %v1244_v16, %v1242_v15 }
 0x21c   : > { %v1972_v21 = vpack.c.bf16 %v1249_v19, %v1247_v17 }
 0x21d   : > { %v1081_v22 = vrot.slane %v1080_v18, 2 }
 0x21f   : > { %v1082_v24 = vadd.f32 %v1081_v22, %v1080_v18  ;;  %v1246_v18 = vld [vmem:[%s2600_s18 + $0x120] sm:$0xff]  ;;  %v1248_v22 = vld [vmem:[%s2600_s18 + $0x130] sm:$0xff] }
 0x220   : > { %v1974_v25 = vpack.c.bf16 %v1248_v22, %v1246_v18 }
 0x221   : > { %v1083_v42 = vrot.slane %v1082_v24, 1 }
 0x223   : > { %v1084_v28 = vadd.f32 %v1083_v42, %v1082_v24  ;;  %v1253_v24 = vld [vmem:[%s2600_s18 + $0x158] sm:$0xff] }
 0x224   : > { %v1976_v42 = vpack.c.bf16 %v1253_v24, %v1251_v23 }
 0x225   : > { %v1086_v32 = vmul.f32 0.00390625, %v1084_v28  ;;  %v1255_v28 = vld [vmem:[%s2600_s18 + $0x168] sm:$0xff] }
 0x227   : > { %v1134_v37 = vsel %vm1133_vm0, %v1086_v32, %v1085_v31  ;;  %v1980_v31 = vpack.c.bf16 %v1257_v29, %v1255_v28  ;;  %v1254_v32 = vld [vmem:[%s2600_s18 + $0x160] sm:$0xff] }
 0x228   : > { %1201 = vmatmul.mubr.f32.vlgmr.msra.gmra.mrb[0].mxu1 %v1134_v37 }
 0x229   : > { %1939 = vmatpush1.bf16.msra.mxu1 %v1938_v33  ;;  %v1256_v33 = vld [vmem:[%s2600_s18 + $0x170] sm:$0xff] }
 0x22a   : > { %1941 = vmatprep.subr.bf16.mxu1 %v1940_v34  ;;  %v1259_v34 = vld [vmem:[%s2600_s18 + $0x188] sm:$0xff]  ;;  %v1982_v36 = vpack.c.bf16 %v1256_v33, %v1254_v32 }
 0x22b   : > { %v1984_v37 = vpack.c.bf16 %v1261_v35, %v1259_v34 }
 0x22d   : > { %1943 = vmatpush1.bf16.msra.mxu1 %v1942_v40  ;;  %v1263_v40 = vld [vmem:[%s2600_s18 + $0x1a8] sm:$0xff] }
 0x22e   : > { %1945 = vmatprep.subr.bf16.mxu1 %v1944_v41  ;;  %v1265_v41 = vld [vmem:[%s2600_s18 + $0x1b8] sm:$0xff] }
 0x22f   : > { %v1988_v44 = vpack.c.bf16 %v1265_v41, %v1263_v40 }
 0x231   : > { %1947 = vmatpush1.bf16.msra.mxu1 %v1946_v47  ;;  %v1267_v47 = vld [vmem:[%s2600_s18 + $0x1c8] sm:$0xff] }
 0x232   : > { %1949 = vmatprep.subr.bf16.mxu1 %v1948_v48  ;;  %v1269_v48 = vld [vmem:[%s2600_s18 + $0x1d8] sm:$0xff] }
 0x233   : > { %v1992_v50 = vpack.c.bf16 %v1269_v48, %v1267_v47 }
 0x235   : > { %1951 = vmatpush1.bf16.msra.mxu1 %v1950_v53  ;;  %v1994_v53 = vpack.c.bf16 %v1268_v52, %v1266_v51 }
 0x236   : > { %1953 = vmatprep.subr.bf16.mxu1 %v1952_v54  ;;  %v1271_v54 = vld [vmem:[%s2600_s18 + $0x1e8] sm:$0xff]  ;;  %s2203_s18 = sshll.u32 %s2316_s1, 4  ;;  %s2204_s18 = int_to_ptr.vmem [resolvable:$false] %s2203_s18 }
 0x237   : > { %v1996_v56 = vpack.c.bf16 %v1273_v55, %v1271_v54  ;;  %s2205_s16 = scalar_lea.vmem %s2204_s18, 64  ;;  %p2206_p8 = scmp.lt.s32.totalorder %s1440_s14, %s2204_s18 }
 0x238   : > { %p2207_p5 = scmp.lt.s32.totalorder %s2205_s16, %s2199_s20 }
 0x239   : > { %1955 = vmatpush1.bf16.msra.mxu1 %v1954_v59  ;;  %v1998_v59 = vpack.c.bf16 %v1272_v58, %v1270_v57 }
 0x23a   : > { %1957 = vmatprep.subr.bf16.mxu1 %v1956_v60  ;;  %v1121_v60 = vlaneseq  ;;  %p2208_p11 = por %p2207_p5, %p2206_p8 }
 0x23c   : > { %v2797_v61 = vshrl.u32 %v1121_v60, 7  ;;  %p2209_p13 = pnand %p2208_p11, %p2202_p1 }
 0x23d   : > { %1959 = vmatpush1.bf16.msra.mxu1 %v1958_v1 }
 0x23e   : > { %1961 = vmatprep.subr.bf16.mxu1 %v1960_v2  ;;  %v1123_v62 = vsub.s32 0, %v2797_v61  ;;  %v1127_v0 = vsub.s32 1, %v2797_v61 }
 0x240   : > { %v1124_v1 = vrot.slane %v1119_v63, %v1123_v62  ;;  %v1128_v2 = vrot.slane %v1119_v63, %v1127_v0 }
 0x241   : > { %1963 = vmatpush1.bf16.msra.mxu1 %v1962_v7 }
 0x242   : > { %1965 = vmatprep.subr.bf16.mxu1 %v1964_v8 }
 0x245   : > { %1967 = vmatpush1.bf16.msra.mxu1 %v1966_v13 }
 0x246   : > { %1969 = vmatprep.subr.bf16.mxu1 %v1968_v14 }
 0x249   : > { %1971 = vmatpush1.bf16.msra.mxu1 %v1970_v20 }
 0x24a   : > { %1973 = vmatprep.subr.bf16.mxu1 %v1972_v21 }
 0x24d   : > { %1975 = vmatpush1.bf16.msra.mxu1 %v1974_v25 }
 0x24e   : > { %1977 = vmatprep.subr.bf16.mxu1 %v1976_v42 }
 0x251   : > { %1979 = vmatpush1.bf16.msra.mxu1 %v1978_v30 }
 0x252   : > { %1981 = vmatprep.subr.bf16.mxu1 %v1980_v31 }
 0x255   : > { %1983 = vmatpush1.bf16.msra.mxu1 %v1982_v36 }
 0x256   : > { %1985 = vmatprep.subr.bf16.mxu1 %v1984_v37 }
 0x259   : > { %1987 = vmatpush1.bf16.msra.mxu1 %v1986_v43 }
 0x25a   : > { %1989 = vmatprep.subr.bf16.mxu1 %v1988_v44 }
 0x25d   : > { %1991 = vmatpush1.bf16.msra.mxu1 %v1990_v49 }
 0x25e   : > { %1993 = vmatprep.subr.bf16.mxu1 %v1992_v50 }
 0x261   : > { %1995 = vmatpush1.bf16.msra.mxu1 %v1994_v53 }
 0x262   : > { %1997 = vmatprep.subr.bf16.mxu1 %v1996_v56 }
 0x265   : > { %1999 = vmatpush1.bf16.msra.mxu1 %v1998_v59 }
 0x2fb   : > { %v1202_v3 = vpop.f32.mrb[0].mxu1 }
 0x2fc   : > { %v1203_v4 = vadd.f32 %v1202_v3, %v1124_v1  ;;  %v1204_v5 = vpop.f32.mrb[1].mxu1 }
 0x2fd   : > { %v1205_v6 = vadd.f32 %v1204_v5, %v1128_v2 }
 0x2fe   : > { %v1207_v7 = vmax.f32 %v1203_v4, 0.0 }
 0x2ff   : > { %v1208_v8 = vmax.f32 %v1205_v6, 0.0 }
 0x300   : > { %1209 = vst [vmem:[%s463_s24] sm:$0x3] %v1207_v7 }
 0x301   : > { %1350 = vmatprep.mubr.f32.mxu1 %v1208_v8 }
 0x302   : > { %1351 = vmatmul.mubr.f32.vlgmr.msra.gmra.mrb[2].mxu1 %v1207_v7 }
 0x303   : > { %2212 = shalt.err (!%p2209_p13)
}
 0x304   : > { %s2213_s23 = scalar_lea.hbm %s2813_s13, 32  ;;  %s2217_s21 = scalar_lea.hbm %s2897_s8, 64 }
 0x305   : > { %p2214_p2 = scmp.ne.s32.totalorder %s2813_s13, %s2213_s23  ;;  %p2218_p0 = scmp.lt.u32.totalorder %s2813_s13, %s2897_s8 }
 0x306   : > { %p2219_p6 = scmp.lt.u32.totalorder %s2217_s21, %s2213_s23  ;;  %p2221_p9 = scmp.lt.u32.totalorder %s2213_s23, %s2813_s13 }
 0x307   : > { %p2215_p7 = pnand %p2214_p2, %p2939_p12 }
 0x308   : > { %p2220_p3 = por %p2219_p6, %p2218_p0 }
 0x309   : > { %p2216_p10 = pneg %p2215_p7 }
 0x30a   : > { %p2222_p4 = por %p2221_p9, %p2220_p3 }
 0x30c   : > { %p2223_p1 = pnand %p2222_p4, %p2216_p10 }
 0x30e   : > { %2226 = shalt.err (!%p2223_p1)
}
 0x30f   : > { %2011 = dma.vmem_to_hbm [thread:$0]  (%p2939_p12), %s1440_s14, 32, %s2813_s13, %s1412_s9  }
 0x310   : > { %s474_s7 = scalar_lea.vmem %s2895_s6, %s1649_s27  ;;  %s1647_s15 = sshll.u32 %s2586_s25, 2 }
 0x311   : > { %v1274_v9 = vld [vmem:[%s474_s7] sm:$0x3]  ;;  %s1663_s27 = sshll.u32 %s2451_s10, 6  ;;  %s456_s14 = scalar_lea.vmem [#allocation10], %s1647_s15 }
 0x312   : > { %v1283_v10 = vrot.slane %v1274_v9, %v1127_v0  ;;  %v1279_v23 = vrot.slane %v1274_v9, %v1123_v62  ;;  %s1426_s12 = sshll.u32 %s456_s14, 4  ;;  %s2940_s20 = sld [smem:[#allocation24_spill]]  ;;  %s2847_s12 = int_to_ptr.vmem [resolvable:$true] %s1426_s12 }
 0x313   : > { %s1407_s18 = scalar_lea.sflag [#allocation4], %s2586_s25  ;;  %s2227_s16 = scalar_lea.vmem %s2847_s12, 64 }
 0x314   : > { %p2228_p8 = scmp.ne.s32.totalorder %s2847_s12, %s2227_s16  ;;  %s2317_s10 = smov [#allocation10]  }
 0x315   : > { %s2231_s23 = sshll.u32 %s2317_s10, 4  ;;  %s2232_s23 = int_to_ptr.vmem [resolvable:$false] %s2231_s23 }
 0x316   : > { %p2229_p5 = pnand %p2228_p8, %p2939_p12  ;;  %s2233_s26 = scalar_lea.vmem %s2232_s23, 128 }
 0x317   : > { %p2234_p13 = scmp.lt.s32.totalorder %s2847_s12, %s2232_s23  ;;  %p2235_p2 = scmp.lt.s32.totalorder %s2233_s26, %s2227_s16 }
 0x318   : > { %s2845_s1 = scalar_lea.hbm %s2940_s20, %s1663_s27  ;;  %p2230_p11 = pneg %p2229_p5 }
 0x319   : > { %p2236_p7 = por %p2235_p2, %p2234_p13 }
 0x31b   : > { %p2237_p10 = pnand %p2236_p7, %p2230_p11 }
 0x3d5   : > { %v1352_v11 = vpop.f32.mrb[2].mxu1 }
 0x3d6   : > { %v1354_v12 = vpop.f32.mrb[3].mxu1  ;;  %v1353_v27 = vadd.f32 %v1352_v11, %v1279_v23 }
 0x3d7   : > { %v1355_v13 = vadd.f32 %v1354_v12, %v1283_v10 }
 0x3d9   : > { %v1360_v14 = vand.u32 2147483647, %v1355_v13  ;;  %v1358_v42 = vmax.f32 %v1355_v13, 0.0 }
 0x3db   : > { %v1362_v15 = vsub.f32 0.0, %v1360_v14 }
 0x3dd   : > { %v1365_v16 = vmul.f32 1.442695, %v1362_v15 }
 0x3df   : > { %2077 = vpow2.f32 %v1365_v16 }
 0x3e9   : > { %v2078_v17 = vpop.eup %2077 }
 0x3ea   : > { %v1376_v19 = vadd.f32 1.0, %v2078_v17  ;;  %v1379_v20 = vmul.f32 -0.5, %v2078_v17  ;;  %v1382_v18 = vand.u32 2147483647, %v2078_v17 }
 0x3ec   : > { %2079 = vlog2.f32 %v1376_v19  ;;  %v1380_v21 = vadd.f32 1.0, %v1379_v20  ;;  %vm1383_vm1 = vcmp.lt.f32.partialorder %v1382_v18, 0.0004427343 }
 0x3ee   : > { %v1381_v25 = vmul.f32 %v2078_v17, %v1380_v21 }
 0x3f6   : > { %v2080_v22 = vpop.eup %2079 }
 0x3f7   : > { %v1378_v24 = vmul.f32 0.6931472, %v2080_v22 }
 0x3f9   : > { %v1384_v26 = vsel %vm1383_vm1, %v1381_v25, %v1378_v24 }
 0x3fa   : > { %v1386_v28 = vadd.f32 %v1384_v26, %v1358_v42 }
 0x3fc   : > { %v1396_v29 = vcombine.low %v1353_v27, %v1386_v28 }
 0x3fe   : > { %1652 = vst.sshfl [vmem:[%s456_s14] sm:$0x33 pattern:$0x76325410] %v1396_v29 }
 0x3ff   : > { %2240 = shalt.err (!%p2237_p10)
}
 0x400   : > { %s2241_s25 = scalar_lea.hbm %s2845_s1, 64  ;;  %s2245_s17 = scalar_lea.hbm %s2940_s20, 128 }
 0x401   : > { %p2242_p0 = scmp.ne.s32.totalorder %s2845_s1, %s2241_s25  ;;  %p2246_p9 = scmp.lt.u32.totalorder %s2845_s1, %s2940_s20 }
 0x402   : > { %p2247_p4 = scmp.lt.u32.totalorder %s2245_s17, %s2241_s25  ;;  %p2249_p8 = scmp.lt.u32.totalorder %s2241_s25, %s2845_s1 }
 0x403   : > { %p2243_p6 = pnand %p2242_p0, %p2939_p12 }
 0x404   : > { %p2248_p1 = por %p2247_p4, %p2246_p9 }
 0x405   : > { %p2244_p3 = pneg %p2243_p6 }
 0x406   : > { %p2250_p5 = por %p2249_p8, %p2248_p1 }
 0x408   : > { %p2251_p11 = pnand %p2250_p5, %p2244_p3 }
 0x40a   : > { %2254 = shalt.err (!%p2251_p11)
}
 0x40b   : > { %2010 = dma.vmem_to_hbm [thread:$0]  (%p2939_p12), %s2847_s12, 64, %s2845_s1, %s1407_s18  }
 0x40c PF: > { %s2941_s22 = sld [smem:[#allocation18_spill]]  ;;  %s2942_s7 = sld [smem:[#allocation22_spill]] }
 0x40d   : > { %p2944_p2 = scmp.ge.s32.totalorder %s2305_s30, 2 }
 0x412   : > { %s1451_s15 = sand.u32 1, %s2941_s22   ;;  %p2943_p13 = scmp.ne.s32.totalorder %s2942_s7, 0 }
 0x413   : > { %s1452_s27 = scalar_lea.sflag [#allocation4], %s1451_s15 }
 0x414   : > { %p2029_p7 = pnand %p2944_p2, %p2943_p13 }
 0x416   : > { %2284 = dma.done.wait (!%p2029_p7), %s1452_s27, 64  }
 0x417   : > { %2286 = vsyncadd (!%p2029_p7), %s1452_s27, 4294967232  ;;  %s1461_s14 = scalar_lea.sflag [#allocation12], %s1451_s15 }
 0x418   : > { %2288 = dma.done.wait (!%p2029_p7), %s1461_s14, 32  }
 0x419   : > { %2290 = vsyncadd (!%p2029_p7), %s1461_s14, 4294967264  ;;  %s2945_s30 = sld [smem:[#allocation20_spill]]  ;;  %s2946_s19 = sld [smem:[#allocation19_spill]] }
 0x41a   : > { %s2947_s29 = sld [smem:[#allocation21_spill]]  ;;  %s2948_s27 = smov %s2297_s28 }
 0x41f   : > { %p29_p12 = scmp.ge.s32.totalorder %s2945_s30, 4   ;;  %s2949_s28 = smov %s2946_s19 }
 0x421   :  { %31 = sbr.rel (!%p29_p12) target bundleno = 13 (0xd), region = 148 }
 0x428   :  { %1466 = vsyncpa [#allocation3], 1 }
 0x429   :  { %1468 = vsyncpa [#allocation3 + $0x1], 1 }
 0x42a   :  { %1469 = vsyncpa [#allocation6], 1 }
 0x42b   :  { %1471 = vsyncpa [#allocation6 + $0x1], 1 }
 0x42c   :  { %1472 = vsyncpa [#allocation9], 1 }
 0x42d   :  { %1474 = vsyncpa [#allocation9 + $0x1], 1 }
 0x42e   :  { %1475 = vsyncpa [#allocation4], 1 }
 0x42f   :  { %1477 = vsyncpa [#allocation4 + $0x1], 1 }
 0x430   :  { %1478 = vsyncpa [#allocation12], 1 }
 0x431   :  { %1480 = vsyncpa [#allocation12 + $0x1], 1 }

</bundles_post_ra>
